<compile_context>
chip_gen: v7x
topology: tpu7x:2x2x1
jax: 0.10.0
libtpu: 0.0.40
codegen_flags: <defaults>
</compile_context>

<pallas_src>
import functools

import numpy as np
import jax
import jax.numpy as jnp
from jax import lax
from jax.experimental import pallas as pl
from jax.experimental.pallas import tpu as pltpu

KW = 4            # body conv kernel size (stride 2, pad 1)
LRELU_SLOPE = 0.01


# ----------------------------------------------------------------------------
# Pallas kernel: entire Discriminator_AU forward, one image per grid step
# ----------------------------------------------------------------------------
def _fused_forward_kernel(norm_ref, x_ref, *refs, n_layers):
    """refs = (w1, b1, ..., wL, bL, w_aus, o_ref); all resident in VMEM.

    norm_ref: SMEM (2,)            [scale, shift] input normalization
    x_ref:    VMEM (1, 1, Din)     flattened (NCHW order) input image
    w_l:      VMEM (K_l, M_l)      conv l lowered to a dense matrix
    b_l:      VMEM (1, M_l)        conv l bias tiled over output positions
    w_aus:    VMEM (K_a, aus_nc)   aus_top conv as a plain matmul (no bias)
    o_ref:    VMEM (1, 1, aus_nc)
    """
    o_ref = refs[-1]
    x = x_ref[0] * norm_ref[0] + norm_ref[1]                   # (1, Din), f32
    for l in range(n_layers):
        w = refs[2 * l][...]
        b = refs[2 * l + 1][...]
        x = jnp.dot(x, w, preferred_element_type=jnp.float32) + b
        x = jnp.where(x > 0, x, LRELU_SLOPE * x)               # LeakyReLU(0.01)
    x = jnp.dot(x, refs[2 * n_layers][...],
                preferred_element_type=jnp.float32)            # aus_top
    o_ref[...] = x.reshape(o_ref.shape)


# ----------------------------------------------------------------------------
# Weight-only preprocessing (run once; weights are static at inference time)
# ----------------------------------------------------------------------------
def _lower_conv_to_matrix(w_hwio, h_in, w_in, input_order):
    """Fold the k=4 / stride=2 / pad=1 conv into a dense
    (Hin*Win*Cin, Hout*Wout*Cout) matrix; padding taps become zero rows."""
    kh_sz, kw_sz, cin, cout = w_hwio.shape
    h_out, w_out = h_in // 2, w_in // 2
    sel_h = np.zeros((h_out, kh_sz, h_in), np.float32)
    for oh in range(h_out):
        for kh in range(kh_sz):
            ih = 2 * oh + kh - 1                       # pad = 1
            if 0 <= ih < h_in:
                sel_h[oh, kh, ih] = 1.0
    sel_w = np.zeros((w_out, kw_sz, w_in), np.float32)
    for ow in range(w_out):
        for kw in range(kw_sz):
            iw = 2 * ow + kw - 1
            if 0 <= iw < w_in:
                sel_w[ow, kw, iw] = 1.0
    # big[ih, iw, ci, oh, ow, co] = sum_{kh,kw} sel_h*sel_w*W[kh,kw,ci,co]
    eq = 'phi,qwj,hwcd->ijcpqd' if input_order == "HWC" else 'phi,qwj,hwcd->cijpqd'
    big = jnp.einsum(eq, sel_h, sel_w, w_hwio)
    return big.reshape(h_in * w_in * cin, h_out * w_out * cout)


def prepare_pallas_params(params, image_size):
    h = w = image_size
    order = "CHW"                 # first layer consumes the NCHW-flattened image
    layers = []
    for w_conv, b_conv in params["convs"]:
        cout = w_conv.shape[-1]
        w_big = _lower_conv_to_matrix(w_conv, h, w, order)
        h, w = h // 2, w // 2
        b_big = jnp.tile(b_conv, h * w).reshape(1, h * w * cout)
        layers.append((w_big, b_big))
        order = "HWC"             # conv outputs are flattened (oh, ow, cout)
    k, _, cin, aus_nc = params["aus_w"].shape
    w_aus = params["aus_w"].reshape(k * k * cin, aus_nc)
    return {"layers": layers, "aus_w": w_aus}


# ----------------------------------------------------------------------------
# Forward pass (semantics of Discriminator_AU.forward)
# ----------------------------------------------------------------------------
def discriminator_au_forward(img_nchw, prepared):
    # TODO(synk): the reference forward resizes to 128x128 via torchvision
    # `transforms` (not even imported there); resize is not implemented — the
    # input must already be (N, C, image_size, image_size).
    img = img_nchw.astype(jnp.float32)

    # Batch-global range normalization, folded into one (scale, shift) pair
    # that is applied inside the kernel.
    mx, mn = img.max(), img.min()
    c1 = jnp.logical_and(mx > 10, mn >= 0)
    s1 = jnp.where(c1, 1.0 / 127.5, 1.0)
    t1 = jnp.where(c1, -1.0, 0.0)
    mx2, mn2 = mx * s1 + t1, mn * s1 + t1
    c2 = jnp.logical_and(mn2 >= 0, mx2 < 2)
    s2 = jnp.where(c2, 2.0, 1.0)
    t2 = jnp.where(c2, -1.0, 0.0)
    norm = jnp.stack([s1 * s2, t1 * s2 + t2]).astype(jnp.float32)   # (2,)

    n = img.shape[0]
    din = img.shape[1] * img.shape[2] * img.shape[3]
    x = img.reshape(n, 1, din)                                      # NCHW flat

    layers = prepared["layers"]
    w_aus = prepared["aus_w"]
    aus_nc = w_aus.shape[1]

    args = [norm, x]
    in_specs = [
        pl.BlockSpec(memory_space=pltpu.MemorySpace.SMEM),          # scale/shift
        pl.BlockSpec((1, 1, din), lambda i: (i, 0, 0)),             # one image
    ]
    for w_l, b_l in layers:                                         # resident
        args += [w_l, b_l]
        in_specs += [pl.BlockSpec(w_l.shape, lambda i: (0, 0)),
                     pl.BlockSpec(b_l.shape, lambda i: (0, 0))]
    args.append(w_aus)
    in_specs.append(pl.BlockSpec(w_aus.shape, lambda i: (0, 0)))

    kernel = functools.partial(_fused_forward_kernel, n_layers=len(layers))
    out = pl.pallas_call(
        kernel,
        out_shape=jax.ShapeDtypeStruct((n, 1, aus_nc), jnp.float32),
        grid=(n,),
        in_specs=in_specs,
        out_specs=pl.BlockSpec((1, 1, aus_nc), lambda i: (i, 0, 0)),
        compiler_params=pltpu.CompilerParams(
            dimension_semantics=("parallel",)),   # batch across v7x's 2 TCs
    )(*args)

    pred = out.reshape(n, aus_nc)
    # mimic torch's `.squeeze()` on the (N, aus_nc, 1, 1) conv output
    return jnp.squeeze(pred[:, :, None, None])


# ----------------------------------------------------------------------------
# Parameters (deterministic synthetic init; shapes follow Discriminator_AU)
# ----------------------------------------------------------------------------
def init_params(key, input_nc=3, aus_nc=17, image_size=16, ndf=8, n_layers=4):
    params = {"convs": []}
    cin, cout = input_nc, ndf
    for _ in range(n_layers):       # all body convs have bias (bias arg truthy)
        key, kw_key, kb_key = jax.random.split(key, 3)
        fan_in = KW * KW * cin
        w = jax.random.normal(kw_key, (KW, KW, cin, cout), jnp.float32) \
            * (2.0 / fan_in) ** 0.5
        b = jax.random.normal(kb_key, (cout,), jnp.float32) * 0.01
        params["convs"].append((w, b))
        cin, cout = cout, cout * 2
    k_size = image_size // (2 ** n_layers)
    key, ka = jax.random.split(key)
    fan_in = k_size * k_size * cin
    params["aus_w"] = jax.random.normal(
        ka, (k_size, k_size, cin, aus_nc), jnp.float32) * (2.0 / fan_in) ** 0.5
    # NOTE: self.dis_top exists in __init__ but is unused in forward -> omitted.
    return params


# ----------------------------------------------------------------------------
# Plain-JAX reference for correctness checking
# ----------------------------------------------------------------------------
def _normalize(img):
    mx, mn = img.max(), img.min()
    img = jnp.where(jnp.logical_and(mx > 10, mn >= 0), (img - 127.5) / 127.5, img)
    mx2, mn2 = img.max(), img.min()
    img = jnp.where(jnp.logical_and(mn2 >= 0, mx2 < 2), img * 2.0 - 1.0, img)
    return img


def reference_forward(img_nchw, params):
    img = _normalize(img_nchw.astype(jnp.float32))
    x = jnp.transpose(img, (0, 2, 3, 1))
    for w, b in params["convs"]:
        x = lax.conv_general_dilated(x, w, (2, 2), ((1, 1), (1, 1)),
                                     dimension_numbers=("NHWC", "HWIO", "NHWC"))
        x = x + b.reshape(1, 1, 1, -1)
        x = jnp.where(x > 0, x, LRELU_SLOPE * x)
    out = lax.conv_general_dilated(x, params["aus_w"], (1, 1), "VALID",
                                   dimension_numbers=("NHWC", "HWIO", "NHWC"))
    return jnp.squeeze(out.transpose(0, 3, 1, 2))


# ----------------------------------------------------------------------------
if __name__ == "__main__":
    # Small instantiation of Discriminator_AU(input_nc=3, aus_nc=17,
    # image_size=16, ndf=8, n_layers=4): channels 3->8->16->32->64, spatial
    # 16->8->4->2->1, aus_top kernel size = 16 / 2**4 = 1.
    BATCH, INPUT_NC, AUS_NC = 2, 3, 17
    IMAGE_SIZE, NDF, N_LAYERS = 16, 8, 4

    key = jax.random.PRNGKey(0)
    key, img_key = jax.random.split(key)
    # image-like input in [0, 1]; forward's range checks rescale it to [-1, 1]
    img = jax.random.uniform(
        img_key, (BATCH, INPUT_NC, IMAGE_SIZE, IMAGE_SIZE), jnp.float32)
    params = init_params(key, INPUT_NC, AUS_NC, IMAGE_SIZE, NDF, N_LAYERS)

    # One-time weight packing (matmul-lowered convs), then the fused kernel.
    prepared = prepare_pallas_params(params, IMAGE_SIZE)
    fwd = jax.jit(discriminator_au_forward)

    out = jax.block_until_ready(fwd(img, prepared))
    ref = jax.block_until_ready(reference_forward(img, params))

    assert out.shape == (BATCH, AUS_NC), out.shape
    assert jnp.allclose(out, ref, rtol=5e-3, atol=5e-3), \
        float(jnp.max(jnp.abs(out - ref)))
    print("KERNEL_OK")
</pallas_src>

<mosaic_0001>
module attributes {stable_mosaic.version = 11 : i64} {
  func.func @_fused_forward_kernel(%arg0: i32, %arg1: memref<2xf32, #tpu.memory_space<smem>>, %arg2: memref<1x1x768xf32, #tpu.memory_space<vmem>>, %arg3: memref<768x512xf32, #tpu.memory_space<vmem>>, %arg4: memref<1x512xf32, #tpu.memory_space<vmem>>, %arg5: memref<512x256xf32, #tpu.memory_space<vmem>>, %arg6: memref<1x256xf32, #tpu.memory_space<vmem>>, %arg7: memref<256x128xf32, #tpu.memory_space<vmem>>, %arg8: memref<1x128xf32, #tpu.memory_space<vmem>>, %arg9: memref<128x64xf32, #tpu.memory_space<vmem>>, %arg10: memref<1x64xf32, #tpu.memory_space<vmem>>, %arg11: memref<64x17xf32, #tpu.memory_space<vmem>>, %arg12: memref<1x1x17xf32, #tpu.memory_space<vmem>>) attributes {dimension_semantics = [#tpu.dimension_semantics<parallel>], iteration_bounds = array<i64: 2>, scalar_prefetch = 0 : i64, scratch_operands = 0 : i64, tpu.core_type = #tpu.core_type<tc>, window_params = [{transform_indices = @transform_0, window_bounds = array<i64: 2>}, {transform_indices = @transform_1, window_bounds = array<i64: 1, 1, 768>}, {pipeline_mode = #tpu.pipeline_mode<synchronous>, transform_indices = @transform_2, window_bounds = array<i64: 768, 512>}, {pipeline_mode = #tpu.pipeline_mode<synchronous>, transform_indices = @transform_3, window_bounds = array<i64: 1, 512>}, {pipeline_mode = #tpu.pipeline_mode<synchronous>, transform_indices = @transform_4, window_bounds = array<i64: 512, 256>}, {pipeline_mode = #tpu.pipeline_mode<synchronous>, transform_indices = @transform_5, window_bounds = array<i64: 1, 256>}, {pipeline_mode = #tpu.pipeline_mode<synchronous>, transform_indices = @transform_6, window_bounds = array<i64: 256, 128>}, {pipeline_mode = #tpu.pipeline_mode<synchronous>, transform_indices = @transform_7, window_bounds = array<i64: 1, 128>}, {pipeline_mode = #tpu.pipeline_mode<synchronous>, transform_indices = @transform_8, window_bounds = array<i64: 128, 64>}, {pipeline_mode = #tpu.pipeline_mode<synchronous>, transform_indices = @transform_9, window_bounds = array<i64: 1, 64>}, {pipeline_mode = #tpu.pipeline_mode<synchronous>, transform_indices = @transform_10, window_bounds = array<i64: 64, 17>}, {transform_indices = @transform_11, window_bounds = array<i64: 1, 1, 17>}]} {
    %c0 = arith.constant 0 : index
    %c0_0 = arith.constant 0 : index
    %c0_1 = arith.constant 0 : index
    %0 = vector.load %arg2[%c0, %c0_0, %c0_1] : memref<1x1x768xf32, #tpu.memory_space<vmem>>, vector<1x1x768xf32>
    %1 = vector.shape_cast %0 : vector<1x1x768xf32> to vector<1x768xf32>
    %c0_2 = arith.constant 0 : index
    %2 = memref.load %arg1[%c0_2] : memref<2xf32, #tpu.memory_space<smem>>
    %3 = vector.broadcast %2 : f32 to vector<1x768xf32>
    %4 = arith.mulf %1, %3 : vector<1x768xf32>
    %c1 = arith.constant 1 : index
    %5 = memref.load %arg1[%c1] : memref<2xf32, #tpu.memory_space<smem>>
    %6 = vector.broadcast %5 : f32 to vector<1x768xf32>
    %7 = arith.addf %4, %6 : vector<1x768xf32>
    %c0_3 = arith.constant 0 : index
    %c0_4 = arith.constant 0 : index
    %8 = vector.load %arg3[%c0_3, %c0_4] : memref<768x512xf32, #tpu.memory_space<vmem>>, vector<768x512xf32>
    %c0_5 = arith.constant 0 : index
    %c0_6 = arith.constant 0 : index
    %9 = vector.load %arg4[%c0_5, %c0_6] : memref<1x512xf32, #tpu.memory_space<vmem>>, vector<1x512xf32>
    %cst = arith.constant dense<0.000000e+00> : vector<1x512xf32>
    %10 = tpu.matmul %7, %8, %cst {dimension_numbers = #tpu.dot_dimension_numbers<[1], [0], [0], [1], [0, 0, 1, 1], [], []>} : vector<1x768xf32>, vector<768x512xf32>, vector<1x512xf32> -> vector<1x512xf32>
    %11 = arith.addf %10, %9 : vector<1x512xf32>
    %cst_7 = arith.constant 0.000000e+00 : f32
    %12 = vector.broadcast %cst_7 : f32 to vector<1x512xf32>
    %13 = arith.cmpf ogt, %11, %12 : vector<1x512xf32>
    %cst_8 = arith.constant 0.00999999977 : f32
    %14 = vector.broadcast %cst_8 : f32 to vector<1x512xf32>
    %15 = arith.mulf %14, %11 : vector<1x512xf32>
    %16 = arith.select %13, %11, %15 : vector<1x512xi1>, vector<1x512xf32>
    %c0_9 = arith.constant 0 : index
    %c0_10 = arith.constant 0 : index
    %17 = vector.load %arg5[%c0_9, %c0_10] : memref<512x256xf32, #tpu.memory_space<vmem>>, vector<512x256xf32>
    %c0_11 = arith.constant 0 : index
    %c0_12 = arith.constant 0 : index
    %18 = vector.load %arg6[%c0_11, %c0_12] : memref<1x256xf32, #tpu.memory_space<vmem>>, vector<1x256xf32>
    %cst_13 = arith.constant dense<0.000000e+00> : vector<1x256xf32>
    %19 = tpu.matmul %16, %17, %cst_13 {dimension_numbers = #tpu.dot_dimension_numbers<[1], [0], [0], [1], [0, 0, 1, 1], [], []>} : vector<1x512xf32>, vector<512x256xf32>, vector<1x256xf32> -> vector<1x256xf32>
    %20 = arith.addf %19, %18 : vector<1x256xf32>
    %cst_14 = arith.constant 0.000000e+00 : f32
    %21 = vector.broadcast %cst_14 : f32 to vector<1x256xf32>
    %22 = arith.cmpf ogt, %20, %21 : vector<1x256xf32>
    %cst_15 = arith.constant 0.00999999977 : f32
    %23 = vector.broadcast %cst_15 : f32 to vector<1x256xf32>
    %24 = arith.mulf %23, %20 : vector<1x256xf32>
    %25 = arith.select %22, %20, %24 : vector<1x256xi1>, vector<1x256xf32>
    %c0_16 = arith.constant 0 : index
    %c0_17 = arith.constant 0 : index
    %26 = vector.load %arg7[%c0_16, %c0_17] : memref<256x128xf32, #tpu.memory_space<vmem>>, vector<256x128xf32>
    %c0_18 = arith.constant 0 : index
    %c0_19 = arith.constant 0 : index
    %27 = vector.load %arg8[%c0_18, %c0_19] : memref<1x128xf32, #tpu.memory_space<vmem>>, vector<1x128xf32>
    %cst_20 = arith.constant dense<0.000000e+00> : vector<1x128xf32>
    %28 = tpu.matmul %25, %26, %cst_20 {dimension_numbers = #tpu.dot_dimension_numbers<[1], [0], [0], [1], [0, 0, 1, 1], [], []>} : vector<1x256xf32>, vector<256x128xf32>, vector<1x128xf32> -> vector<1x128xf32>
    %29 = arith.addf %28, %27 : vector<1x128xf32>
    %cst_21 = arith.constant 0.000000e+00 : f32
    %30 = vector.broadcast %cst_21 : f32 to vector<1x128xf32>
    %31 = arith.cmpf ogt, %29, %30 : vector<1x128xf32>
    %cst_22 = arith.constant 0.00999999977 : f32
    %32 = vector.broadcast %cst_22 : f32 to vector<1x128xf32>
    %33 = arith.mulf %32, %29 : vector<1x128xf32>
    %34 = arith.select %31, %29, %33 : vector<1x128xi1>, vector<1x128xf32>
    %c0_23 = arith.constant 0 : index
    %c0_24 = arith.constant 0 : index
    %35 = vector.load %arg9[%c0_23, %c0_24] : memref<128x64xf32, #tpu.memory_space<vmem>>, vector<128x64xf32>
    %c0_25 = arith.constant 0 : index
    %c0_26 = arith.constant 0 : index
    %36 = vector.load %arg10[%c0_25, %c0_26] : memref<1x64xf32, #tpu.memory_space<vmem>>, vector<1x64xf32>
    %cst_27 = arith.constant dense<0.000000e+00> : vector<1x64xf32>
    %37 = tpu.matmul %34, %35, %cst_27 {dimension_numbers = #tpu.dot_dimension_numbers<[1], [0], [0], [1], [0, 0, 1, 1], [], []>} : vector<1x128xf32>, vector<128x64xf32>, vector<1x64xf32> -> vector<1x64xf32>
    %38 = arith.addf %37, %36 : vector<1x64xf32>
    %cst_28 = arith.constant 0.000000e+00 : f32
    %39 = vector.broadcast %cst_28 : f32 to vector<1x64xf32>
    %40 = arith.cmpf ogt, %38, %39 : vector<1x64xf32>
    %cst_29 = arith.constant 0.00999999977 : f32
    %41 = vector.broadcast %cst_29 : f32 to vector<1x64xf32>
    %42 = arith.mulf %41, %38 : vector<1x64xf32>
    %43 = arith.select %40, %38, %42 : vector<1x64xi1>, vector<1x64xf32>
    %c0_30 = arith.constant 0 : index
    %c0_31 = arith.constant 0 : index
    %44 = vector.load %arg11[%c0_30, %c0_31] : memref<64x17xf32, #tpu.memory_space<vmem>>, vector<64x17xf32>
    %cst_32 = arith.constant dense<0.000000e+00> : vector<1x17xf32>
    %45 = tpu.matmul %43, %44, %cst_32 {dimension_numbers = #tpu.dot_dimension_numbers<[1], [0], [0], [1], [0, 0, 1, 1], [], []>} : vector<1x64xf32>, vector<64x17xf32>, vector<1x17xf32> -> vector<1x17xf32>
    %46 = vector.shape_cast %45 : vector<1x17xf32> to vector<1x1x17xf32>
    %c0_33 = arith.constant 0 : index
    %c0_34 = arith.constant 0 : index
    %c0_35 = arith.constant 0 : index
    %47 = vector.load %arg12[%c0_33, %c0_34, %c0_35] : memref<1x1x17xf32, #tpu.memory_space<vmem>>, vector<1x1x17xf32>
    tpu.vector_store %arg12[%c0_33, %c0_34, %c0_35], %46 {strides = array<i32>} : memref<1x1x17xf32, #tpu.memory_space<vmem>>, vector<1x1x17xf32>,
    return
  }
  func.func @transform_0(%arg0: i32) -> i32 {
    %c0_i32 = arith.constant 0 : i32
    %c0_i32_0 = arith.constant 0 : i32
    return %c0_i32 : i32
  }
  func.func @transform_1(%arg0: i32) -> (i32, i32, i32) {
    %c0_i32 = arith.constant 0 : i32
    %c0_i32_0 = arith.constant 0 : i32
    %c0_i32_1 = arith.constant 0 : i32
    return %arg0, %c0_i32, %c0_i32_0 : i32, i32, i32
  }
  func.func @transform_2(%arg0: i32) -> (i32, i32) {
    %c0_i32 = arith.constant 0 : i32
    %c0_i32_0 = arith.constant 0 : i32
    %c0_i32_1 = arith.constant 0 : i32
    return %c0_i32, %c0_i32_0 : i32, i32
  }
  func.func @transform_3(%arg0: i32) -> (i32, i32) {
    %c0_i32 = arith.constant 0 : i32
    %c0_i32_0 = arith.constant 0 : i32
    %c0_i32_1 = arith.constant 0 : i32
    return %c0_i32, %c0_i32_0 : i32, i32
  }
  func.func @transform_4(%arg0: i32) -> (i32, i32) {
    %c0_i32 = arith.constant 0 : i32
    %c0_i32_0 = arith.constant 0 : i32
    %c0_i32_1 = arith.constant 0 : i32
    return %c0_i32, %c0_i32_0 : i32, i32
  }
  func.func @transform_5(%arg0: i32) -> (i32, i32) {
    %c0_i32 = arith.constant 0 : i32
    %c0_i32_0 = arith.constant 0 : i32
    %c0_i32_1 = arith.constant 0 : i32
    return %c0_i32, %c0_i32_0 : i32, i32
  }
  func.func @transform_6(%arg0: i32) -> (i32, i32) {
    %c0_i32 = arith.constant 0 : i32
    %c0_i32_0 = arith.constant 0 : i32
    %c0_i32_1 = arith.constant 0 : i32
    return %c0_i32, %c0_i32_0 : i32, i32
  }
  func.func @transform_7(%arg0: i32) -> (i32, i32) {
    %c0_i32 = arith.constant 0 : i32
    %c0_i32_0 = arith.constant 0 : i32
    %c0_i32_1 = arith.constant 0 : i32
    return %c0_i32, %c0_i32_0 : i32, i32
  }
  func.func @transform_8(%arg0: i32) -> (i32, i32) {
    %c0_i32 = arith.constant 0 : i32
    %c0_i32_0 = arith.constant 0 : i32
    %c0_i32_1 = arith.constant 0 : i32
    return %c0_i32, %c0_i32_0 : i32, i32
  }
  func.func @transform_9(%arg0: i32) -> (i32, i32) {
    %c0_i32 = arith.constant 0 : i32
    %c0_i32_0 = arith.constant 0 : i32
    %c0_i32_1 = arith.constant 0 : i32
    return %c0_i32, %c0_i32_0 : i32, i32
  }
  func.func @transform_10(%arg0: i32) -> (i32, i32) {
    %c0_i32 = arith.constant 0 : i32
    %c0_i32_0 = arith.constant 0 : i32
    %c0_i32_1 = arith.constant 0 : i32
    return %c0_i32, %c0_i32_0 : i32, i32
  }
  func.func @transform_11(%arg0: i32) -> (i32, i32, i32) {
    %c0_i32 = arith.constant 0 : i32
    %c0_i32_0 = arith.constant 0 : i32
    %c0_i32_1 = arith.constant 0 : i32
    return %arg0, %c0_i32, %c0_i32_0 : i32, i32, i32
  }
}

</mosaic_0001>

<bundles_post_ra>
// kernel: discriminator_au_forward.1
= control target key start
LH: loop header
LB: loop body
LE: loop exit
PB: predicated region body
PF: predicated region fallthrough
CT: control target
= control target key end

     0   :  { %s3768_s0 = inlined_call_operand.vmem [shape: f32[2], index: 0, kind: input, shape index: {}]   ;;  %s3769_s1 = inlined_call_operand.vmem [shape: f32[2,1,768], index: 1, kind: input, shape index: {}]   ;;  %s3770_s2 = inlined_call_operand.hbm [shape: f32[768,512], index: 2, kind: input, shape index: {}]   ;;  %s3771_s3 = inlined_call_operand.hbm [shape: f32[1,512], index: 3, kind: input, shape index: {}]   ;;  %s3772_s4 = inlined_call_operand.hbm [shape: f32[512,256], index: 4, kind: input, shape index: {}]   ;;  %s3773_s5 = inlined_call_operand.hbm [shape: f32[1,256], index: 5, kind: input, shape index: {}]   ;;  %s3774_s6 = inlined_call_operand.hbm [shape: f32[256,128], index: 6, kind: input, shape index: {}]   ;;  %s3775_s7 = inlined_call_operand.hbm [shape: f32[1,128], index: 7, kind: input, shape index: {}]   ;;  %s3776_s8 = inlined_call_operand.vmem [shape: f32[128,64], index: 8, kind: input, shape index: {}]   ;;  %s3777_s9 = inlined_call_operand.hbm [shape: f32[1,64], index: 9, kind: input, shape index: {}]   ;;  %s3778_s10 = inlined_call_operand.vmem [shape: f32[64,17], index: 10, kind: input, shape index: {}]   ;;  %s3779_s11 = inlined_call_operand.hbm [shape: f32[2,1,17], index: 11, kind: output, shape index: {}]  }
   0x1   :  { %3788 = sst [smem:[#allocation28_spill]] %s3768_s0 }
   0x2   :  { %3789 = sst [smem:[#allocation29_spill]] %s3771_s3 }
   0x3   :  { %16 = vsyncpa [#allocation5], 0 }
   0x4   :  { %17 = vsyncpa [#allocation3], 0 }
   0x5   :  { %18 = vsyncpa [#allocation8], 0 }
   0x6   :  { %19 = vsyncpa [#allocation11], 0 }
   0x7   :  { %20 = vsyncpa [#allocation14], 0 }
   0x8   :  { %21 = vsyncpa [#allocation4], 0 }
   0x9   :  { %23 = vsyncpa [#allocation4 + $0x1], 0  ;;  %s3327_s17 = smov 0   ;;  %s3329_s18 = smov 0  }
   0xa   :  { %s3331_s19 = smov 0   ;;  %s3333_s20 = smov 0  }
   0xb LB: > { %3790 = sst [smem:[#allocation23_spill]] %s3235_s17  ;;  %s3348_s21 = sadd.s32 4294967295, %s3247_s20   ;;  %s3247_s20 = sphi %s3333_s20, %s3818_s20   ;;  %s3243_s19 = sphi %s3331_s19, %s3820_s19   ;;  %s3239_s18 = sphi %s3329_s18, %s3822_s18   ;;  %s3235_s17 = sphi %s3327_s17, %s3821_s17  }
   0xc   : > { %3791 = sst [smem:[#allocation24_spill]] %s3243_s19  ;;  %s2088_s22 = sadd.s32 4294967294, %s3247_s20  }
   0xd   : > { %s3352_s23 = sadd.s32 1, %s3247_s20   ;;  %s272_s24 = sadd.s32 1, %s3243_s19 }
   0xe   : > { %3792 = sst [smem:[#allocation25_spill]] %s3352_s23  ;;  %s269_s25 = ssub.s32 %s3247_s20, %s3352_s23 }
   0xf   : > { %p282_p0 = scmp.ne.s32.totalorder %s3243_s19, %s3239_s18  ;;  %p270_p1 = scmp.eq.s32.totalorder %s269_s25, 0 }
  0x10   : > { %p283_p2 = scmp.eq.s32.totalorder %s3348_s21, 1  ;;  %p288_p3 = scmp.ne.s32.totalorder %s3239_s18, %s3235_s17 }
  0x11   : > { %p289_p4 = scmp.eq.s32.totalorder %s2088_s22, 1  ;;  %p2089_p7 = scmp.ge.s32.totalorder %s3247_s20, 1 }
  0x12   : > { %s3363_s26 = scalar_select %p270_p1, %s3243_s19, %s272_s24  }
  0x13   : > { %p3365_p5 = por %p283_p2, %p282_p0  ;;  %p3369_p6 = por %p289_p4, %p288_p3 }
  0x14   : > { %3793 = sst [smem:[#allocation26_spill]] %s3363_s26  ;;  %p296_p8 = scmp.lt.s32.totalorder %s3247_s20, 3 }
  0x15   : > { %s3794_s27 = scalar_select %p3365_p5, 1, 0 }
  0x16   : > { %s3795_s28 = scalar_select %p3369_p6, 1, 0 }
  0x17   : > { %p3785_p9 = scmp.eq.s32.totalorder %s3348_s21, 0  ;;  %p3376_p10 = pnand %p2089_p7, %p296_p8 }
  0x18   : > { %3796 = sst [smem:[#allocation27_spill]] %s3795_s28  ;;  %s3249_s30 = smov [#allocation7]  }
  0x19   : > { %s3797_s29 = scalar_select %p3376_p10, 1, 0 }
  0x1a   : > { %s333_s12 = sshll.u32 %s3249_s30, 4  ;;  %p2859_p11 = pneg %p3376_p10  ;;  %s334_s12 = int_to_ptr.vmem [resolvable:$true] %s333_s12 }
  0x1b   : > { %s3250_s13 = smov [#allocation10]   ;;  %s3251_s16 = smov [#allocation13]  }
  0x1c   : > { %s357_s14 = sshll.u32 %s3250_s13, 4  ;;  %p3384_p12 = pnand %p3785_p9, %p2859_p11  ;;  %s3388_s14 = int_to_ptr.vmem [resolvable:$true] %s357_s14 }
  0x1d   : > { %s381_s22 = sshll.u32 %s3251_s16, 4  ;;  %s3799_s0 = sld [smem:[#allocation28_spill]]  ;;  %s3393_s22 = int_to_ptr.vmem [resolvable:$true] %s381_s22 }
  0x1e   : > { %s3800_s3 = sld [smem:[#allocation29_spill]]  ;;  %p3403_p0 = pneg %p3384_p12 }
  0x24   : > { %s2954_s13 = scalar_lea.hbm %s3800_s3, 64 }
  0x25   : > { %p2955_p13 = scmp.ne.s32.totalorder %s3800_s3, %s2954_s13  ;;  %p2961_p3 = scmp.lt.u32.totalorder %s2954_s13, %s3800_s3 }
  0x27   : > { %p2957_p1 = pnand %p3403_p0, %p2955_p13 }
  0x29   : > { %p2958_p2 = pneg %p2957_p1 }
  0x2b   : > { %p2963_p4 = pnand %p2961_p3, %p2958_p2 }
  0x2d   : > { %2966 = shalt.err (!%p2963_p4)
}
  0x2e   : > { %s2967_s19 = scalar_lea.vmem %s334_s12, 64  ;;  %p2975_p9 = scmp.lt.s32.totalorder %s334_s12, %s334_s12 }
  0x2f   : > { %p2968_p7 = scmp.ne.s32.totalorder %s334_s12, %s2967_s19  ;;  %p2976_p6 = scmp.lt.s32.totalorder %s2967_s19, %s2967_s19 }
  0x31   : > { %p2970_p8 = pnand %p2968_p7, %p3403_p0  ;;  %p2977_p5 = por %p2976_p6, %p2975_p9 }
  0x33   : > { %p2971_p11 = pneg %p2970_p8 }
  0x35   : > { %p2978_p10 = pnand %p2977_p5, %p2971_p11 }
  0x37   : > { %2981 = shalt.err (!%p2978_p10)
}
  0x38   : > { %2868 = dma.hbm_to_vmem [thread:$0]  (!%p3384_p12), %s3800_s3, 64, %s334_s12, [#allocation8]  }
  0x39   : > { %s2982_s13 = scalar_lea.hbm %s3773_s5, 32 }
  0x3a   : > { %p2983_p13 = scmp.ne.s32.totalorder %s3773_s5, %s2982_s13  ;;  %p2989_p5 = scmp.lt.u32.totalorder %s2982_s13, %s3773_s5 }
  0x3c   : > { %p2985_p1 = pnand %p2983_p13, %p3403_p0 }
  0x3e   : > { %p2986_p6 = pneg %p2985_p1 }
  0x40   : > { %p2991_p9 = pnand %p2989_p5, %p2986_p6 }
  0x42   : > { %2994 = shalt.err (!%p2991_p9)
}
  0x43   : > { %s2995_s12 = scalar_lea.vmem %s3388_s14, 32  ;;  %p3003_p4 = scmp.lt.s32.totalorder %s3388_s14, %s3388_s14 }
  0x44   : > { %p2996_p10 = scmp.ne.s32.totalorder %s3388_s14, %s2995_s12  ;;  %p3004_p7 = scmp.lt.s32.totalorder %s2995_s12, %s2995_s12 }
  0x46   : > { %p2998_p2 = pnand %p2996_p10, %p3403_p0  ;;  %p3005_p8 = por %p3004_p7, %p3003_p4 }
  0x48   : > { %p2999_p3 = pneg %p2998_p2 }
  0x4a   : > { %p3006_p11 = pnand %p3005_p8, %p2999_p3 }
  0x4c   : > { %3009 = shalt.err (!%p3006_p11)
}
  0x4d   : > { %2874 = dma.hbm_to_vmem [thread:$0]  (!%p3384_p12), %s3773_s5, 32, %s3388_s14, [#allocation11]  }
  0x4e   : > { %s3010_s30 = scalar_lea.hbm %s3775_s7, 16 }
  0x4f   : > { %p3011_p13 = scmp.ne.s32.totalorder %s3775_s7, %s3010_s30  ;;  %p3017_p5 = scmp.lt.u32.totalorder %s3010_s30, %s3775_s7 }
  0x51   : > { %p3013_p1 = pnand %p3011_p13, %p3403_p0 }
  0x53   : > { %p3014_p6 = pneg %p3013_p1 }
  0x55   : > { %p3019_p9 = pnand %p3017_p5, %p3014_p6 }
  0x57   : > { %3022 = shalt.err (!%p3019_p9)
}
  0x58   : > { %s3023_s14 = scalar_lea.vmem %s3393_s22, 16  ;;  %s3030_s12 = scalar_lea.vmem %s3393_s22, 32 }
  0x59   : > { %p3024_p10 = scmp.ne.s32.totalorder %s3393_s22, %s3023_s14  ;;  %p3031_p4 = scmp.lt.s32.totalorder %s3393_s22, %s3393_s22 }
  0x5a   : > { %p3032_p7 = scmp.lt.s32.totalorder %s3030_s12, %s3023_s14 }
  0x5b   : > { %p3026_p2 = pnand %p3024_p10, %p3403_p0 }
  0x5c   : > { %p3033_p8 = por %p3032_p7, %p3031_p4 }
  0x5d   : > { %p3027_p3 = pneg %p3026_p2 }
  0x5f   : > { %p3034_p11 = pnand %p3033_p8, %p3027_p3 }
  0x61   : > { %3037 = shalt.err (!%p3034_p11)
}
  0x62   : > { %2880 = dma.hbm_to_vmem [thread:$0]  (!%p3384_p12), %s3775_s7, 16, %s3393_s22, [#allocation14]  }
  0x63   : > { %s3802_s30 = sshll.u32 %s3799_s0, 4  ;;  %s310_s30 = int_to_ptr.vmem [resolvable:$true] %s3802_s30 }
  0x64   : > { %s3038_s13 = scalar_lea.vmem %s310_s30, 16  ;;  %p3046_p5 = scmp.lt.s32.totalorder %s310_s30, %s310_s30 }
  0x65   : > { %p3039_p13 = scmp.ne.s32.totalorder %s310_s30, %s3038_s13  ;;  %p3047_p9 = scmp.lt.s32.totalorder %s3038_s13, %s3038_s13 }
  0x67   : > { %p3041_p1 = pnand %p3039_p13, %p3403_p0  ;;  %p3048_p10 = por %p3047_p9, %p3046_p5 }
  0x69   : > { %p3042_p6 = pneg %p3041_p1 }
  0x6b   : > { %p3049_p2 = pnand %p3048_p10, %p3042_p6 }
  0x6d   : > { %3052 = shalt.err (!%p3049_p2)
}
  0x6e   : > { %s3252_s16 = smov [#allocation2]   ;;  %s3253_s22 = smov [#allocation6]  }
  0x6f   : > { %2862 = dma.vmem_to_smem (!%p3384_p12), %s310_s30, 16, %s3252_s16, [#allocation5]  }
  0x70   : > { %s319_s24 = sshll.u32 %s3253_s22, 4  ;;  %s3053_s12 = scalar_lea.hbm %s3770_s2, 49152  ;;  %s320_s24 = int_to_ptr.vmem [resolvable:$true] %s319_s24 }
  0x71   : > { %p3054_p3 = scmp.ne.s32.totalorder %s3770_s2, %s3053_s12  ;;  %p3060_p8 = scmp.lt.u32.totalorder %s3053_s12, %s3770_s2 }
  0x73   : > { %p3056_p4 = pnand %p3054_p3, %p3403_p0 }
  0x75   : > { %p3057_p7 = pneg %p3056_p4 }
  0x77   : > { %p3062_p11 = pnand %p3060_p8, %p3057_p7 }
  0x79   : > { %3065 = shalt.err (!%p3062_p11)
}
  0x7a   : > { %s3066_s30 = scalar_lea.vmem %s320_s24, 49152  ;;  %p3074_p5 = scmp.lt.s32.totalorder %s320_s24, %s320_s24 }
  0x7b   : > { %p3067_p13 = scmp.ne.s32.totalorder %s320_s24, %s3066_s30  ;;  %p3075_p9 = scmp.lt.s32.totalorder %s3066_s30, %s3066_s30 }
  0x7d   : > { %p3069_p1 = pnand %p3067_p13, %p3403_p0  ;;  %p3076_p10 = por %p3075_p9, %p3074_p5 }
  0x7f   : > { %p3070_p6 = pneg %p3069_p1 }
  0x81   : > { %p3077_p2 = pnand %p3076_p10, %p3070_p6 }
  0x83   : > { %3080 = shalt.err (!%p3077_p2)
}
  0x84   : > { %s3254_s13 = smov 512   ;;  %s3255_s16 = smov 32  }
  0x85   : > { %2865 = dma.hbm_to_vmem [thread:$0]  (!%p3384_p12), %s3770_s2, 49152, %s320_s24, [#allocation3], %s3254_s13, %s3254_s13, %s3255_s16  }
  0x86   : > { %s3256_s14 = smov [#allocation9]   ;;  %s3081_s28 = scalar_lea.hbm %s3772_s4, 16384 }
  0x87   : > { %s343_s12 = sshll.u32 %s3256_s14, 4  ;;  %p3082_p3 = scmp.ne.s32.totalorder %s3772_s4, %s3081_s28  ;;  %s344_s12 = int_to_ptr.vmem [resolvable:$true] %s343_s12 }
  0x88   : > { %p3088_p8 = scmp.lt.u32.totalorder %s3081_s28, %s3772_s4 }
  0x89   : > { %p3084_p4 = pnand %p3082_p3, %p3403_p0 }
  0x8b   : > { %p3085_p7 = pneg %p3084_p4 }
  0x8d   : > { %p3090_p11 = pnand %p3088_p8, %p3085_p7 }
  0x8f   : > { %3093 = shalt.err (!%p3090_p11)
}
  0x90   : > { %s3094_s24 = scalar_lea.vmem %s344_s12, 16384  ;;  %p3102_p5 = scmp.lt.s32.totalorder %s344_s12, %s344_s12 }
  0x91   : > { %p3095_p13 = scmp.ne.s32.totalorder %s344_s12, %s3094_s24  ;;  %p3103_p9 = scmp.lt.s32.totalorder %s3094_s24, %s3094_s24 }
  0x93   : > { %p3097_p1 = pnand %p3095_p13, %p3403_p0  ;;  %p3104_p10 = por %p3103_p9, %p3102_p5 }
  0x95   : > { %p3098_p6 = pneg %p3097_p1 }
  0x97   : > { %p3105_p2 = pnand %p3104_p10, %p3098_p6 }
  0x99   : > { %3108 = shalt.err (!%p3105_p2)
}
  0x9a   : > { %s3257_s13 = smov 256   ;;  %s3258_s16 = smov 16  }
  0x9b   : > { %2871 = dma.hbm_to_vmem [thread:$0]  (!%p3384_p12), %s3772_s4, 16384, %s344_s12, [#allocation8], %s3257_s13, %s3257_s13, %s3258_s16  }
  0x9c   : > { %s3259_s22 = smov [#allocation12]   ;;  %s3109_s23 = scalar_lea.hbm %s3774_s6, 4096 }
  0x9d   : > { %s367_s19 = sshll.u32 %s3259_s22, 4  ;;  %p3110_p3 = scmp.ne.s32.totalorder %s3774_s6, %s3109_s23  ;;  %s368_s19 = int_to_ptr.vmem [resolvable:$true] %s367_s19 }
  0x9e   : > { %p3116_p8 = scmp.lt.u32.totalorder %s3109_s23, %s3774_s6 }
  0x9f   : > { %p3112_p4 = pnand %p3110_p3, %p3403_p0 }
  0xa1   : > { %p3113_p7 = pneg %p3112_p4 }
  0xa3   : > { %p3118_p11 = pnand %p3116_p8, %p3113_p7 }
  0xa5   : > { %3121 = shalt.err (!%p3118_p11)
}
  0xa6   : > { %s3122_s12 = scalar_lea.vmem %s368_s19, 4096  ;;  %p3130_p5 = scmp.lt.s32.totalorder %s368_s19, %s368_s19 }
  0xa7   : > { %p3123_p13 = scmp.ne.s32.totalorder %s368_s19, %s3122_s12  ;;  %p3131_p9 = scmp.lt.s32.totalorder %s3122_s12, %s3122_s12 }
  0xa9   : > { %p3125_p1 = pnand %p3123_p13, %p3403_p0  ;;  %p3132_p10 = por %p3131_p9, %p3130_p5 }
  0xab   : > { %p3126_p6 = pneg %p3125_p1 }
  0xad   : > { %p3133_p2 = pnand %p3132_p10, %p3126_p6 }
  0xaf   : > { %3136 = shalt.err (!%p3133_p2)
}
  0xb0   : > { %s3260_s13 = smov 128   ;;  %s3261_s16 = smov 8  }
  0xb1   : > { %2877 = dma.hbm_to_vmem [thread:$0]  (!%p3384_p12), %s3774_s6, 4096, %s368_s19, [#allocation11], %s3260_s13, %s3260_s13, %s3261_s16  }
  0xb2   : > { %s3262_s22 = smov [#allocation15]   ;;  %s3137_s28 = scalar_lea.hbm %s3777_s9, 16 }
  0xb3   : > { %s395_s14 = sshll.u32 %s3262_s22, 4  ;;  %p3138_p3 = scmp.ne.s32.totalorder %s3777_s9, %s3137_s28  ;;  %s396_s14 = int_to_ptr.vmem [resolvable:$true] %s395_s14 }
  0xb4   : > { %p3144_p8 = scmp.lt.u32.totalorder %s3137_s28, %s3777_s9 }
  0xb5   : > { %p3140_p4 = pnand %p3138_p3, %p3403_p0 }
  0xb7   : > { %p3141_p7 = pneg %p3140_p4 }
  0xb9   : > { %p3146_p11 = pnand %p3144_p8, %p3141_p7 }
  0xbb   : > { %3149 = shalt.err (!%p3146_p11)
}
  0xbc   : > { %s3150_s19 = scalar_lea.vmem %s396_s14, 16  ;;  %s3157_s13 = scalar_lea.vmem %s396_s14, 32 }
  0xbd   : > { %p3151_p13 = scmp.ne.s32.totalorder %s396_s14, %s3150_s19  ;;  %p3158_p5 = scmp.lt.s32.totalorder %s396_s14, %s396_s14 }
  0xbe   : > { %p3159_p9 = scmp.lt.s32.totalorder %s3157_s13, %s3150_s19 }
  0xbf   : > { %p3153_p1 = pnand %p3151_p13, %p3403_p0 }
  0xc0   : > { %p3160_p10 = por %p3159_p9, %p3158_p5 }
  0xc1   : > { %p3154_p6 = pneg %p3153_p1 }
  0xc3   : > { %p3161_p2 = pnand %p3160_p10, %p3154_p6 }
  0xc5   : > { %3164 = shalt.err (!%p3161_p2)
}
  0xc6   : > { %2883 = dma.hbm_to_vmem [thread:$0]  (!%p3384_p12), %s3777_s9, 16, %s396_s14, [#allocation14]  }
  0xc7   : > { %p3803_p3 = scmp.ne.s32.totalorder %s3797_s29, 0 }
  0xc8   : > { %p3804_p4 = scmp.eq.s32.totalorder (!%p3803_p3), %s3348_s21, 0 }
  0xc9   : > { %418 = sbr.rel (%p3803_p3) target bundleno = 1585 (0x631), region = 64 }
  0xd0   : > { %3210 = dma.done.wait (%p3804_p4), [#allocation5], 16   ;;  %p3805_p0 = pmov %p3804_p4 }
  0xd2   : > { %3212 = vsyncadd (%p3805_p0), [#allocation5], 4294967280  ;;  %p3806_p7 = pmov %p3805_p0 }
  0xd3   : > { %p3807_p8 = pmov %p3805_p0 }
  0xd4   : > { %3214 = dma.done.wait (%p3806_p7), [#allocation3], 49152  }
  0xd5   : > { %3216 = vsyncadd (%p3807_p8), [#allocation3], 4294918144  ;;  %p3808_p11 = pmov %p3805_p0 }
  0xd6   : > { %p3809_p12 = pmov %p3805_p0 }
  0xd7   : > { %3218 = dma.done.wait (%p3808_p11), [#allocation8], 16448  }
  0xd8   : > { %3220 = vsyncadd (%p3809_p12), [#allocation8], 4294950848  ;;  %p3810_p13 = pmov %p3805_p0 }
  0xd9   : > { %p3811_p1 = pmov %p3805_p0 }
  0xda   : > { %3222 = dma.done.wait (%p3810_p13), [#allocation11], 4128  }
  0xdb   : > { %3224 = vsyncadd (%p3811_p1), [#allocation11], 4294963168  ;;  %p3812_p6 = pmov %p3805_p0 }
  0xdc   : > { %p3813_p5 = pmov %p3805_p0 }
  0xdd   : > { %3226 = dma.done.wait (%p3812_p6), [#allocation14], 32  }
  0xde   : > { %3228 = vsyncadd (%p3813_p5), [#allocation14], 4294967264 }
  0xdf   : > { %452 = sfence }
  0xe0   : > { %v497_v0 = vld [vmem:[#allocation6 + $0x8] sm:$0xff]  ;;  %v499_v2 = vld [vmem:[#allocation6 + $0x18] sm:$0xff]  ;;  %v496_v5 = vld [vmem:[#allocation6] sm:$0xff]  ;;  %p485_p9 = scmp.lt.s32.totalorder %s3348_s21, 1  ;;  %s3574_s29 = sld [smem:[#allocation2]]  ;;  %vm3264_vm6 = vmmov 0  }
  0xe1   : > { %v501_v1 = vld [vmem:[#allocation6 + $0x28] sm:$0xff]  ;;  %v503_v4 = vld [vmem:[#allocation6 + $0x38] sm:$0xff]  ;;  %v500_v6 = vld [vmem:[#allocation6 + $0x20] sm:$0xff]  ;;  %s3576_s15 = sld [smem:[#allocation2 + $0x1]]  ;;  %vm1863_vm9 = vcmask 523264   ;;  %s483_s22 = sand.u32 1, %s3239_s18  }
  0xe2   : > { %v2228_v3 = vpack.c.bf16 %v501_v1, %v497_v0  ;;  %v2420_v7 = vpack.c.bf16 %v503_v4, %v499_v2  ;;  %v2230_v8 = vpack.c.bf16 %v500_v6, %v496_v5  ;;  %v498_v9 = vld [vmem:[#allocation6 + $0x10] sm:$0xff]  ;;  %v505_v11 = vld [vmem:[#allocation6 + $0x48] sm:$0xff]  ;;  %v507_v14 = vld [vmem:[#allocation6 + $0x58] sm:$0xff]  ;;  %s3572_s17 = scalar_select %p485_p9, %s3348_s21, 1  ;;  %vm1937_vm10 = vcmask 131072  }
  0xe3   : > { %v502_v10 = vld [vmem:[#allocation6 + $0x30] sm:$0xff]  ;;  %v509_v13 = vld [vmem:[#allocation6 + $0x68] sm:$0xff]  ;;  %v511_v15 = vld [vmem:[#allocation6 + $0x78] sm:$0xff]  ;;  %s2110_s14 = sshll.u32 %s3348_s21, 4  ;;  %s1940_s24 = scalar_lea.sflag [#allocation4], %s483_s22 }
  0xe4   : > { %2229 = vmatprep.subr.bf16.mxu0 %v2228_v3  ;;  %v2422_v12 = vpack.c.bf16 %v502_v10, %v498_v9  ;;  %2421 = vmatprep.subr.bf16.mxu1 %v2420_v7  ;;  %v2232_v16 = vpack.c.bf16 %v509_v13, %v505_v11  ;;  %v2424_v17 = vpack.c.bf16 %v511_v15, %v507_v14  ;;  %v504_v18 = vld [vmem:[#allocation6 + $0x40] sm:$0xff]  ;;  %v506_v20 = vld [vmem:[#allocation6 + $0x50] sm:$0xff]  ;;  %v513_v23 = vld [vmem:[#allocation6 + $0x88] sm:$0xff]  ;;  %s2824_s3 = smul.u32 6, %s3572_s17  ;;  %s3726_s30 = scalar_lea.hbm %s3779_s11, %s2110_s14 }
  0xe5   : > { %2231 = vmatpush1.bf16.msra.mxu0 %v2230_v8  ;;  %v508_v19 = vld [vmem:[#allocation6 + $0x60] sm:$0xff]  ;;  %v510_v22 = vld [vmem:[#allocation6 + $0x70] sm:$0xff]  ;;  %v517_v24 = vld [vmem:[#allocation6 + $0xa8] sm:$0xff]  ;;  %p3814_p2 = scmp.ne.s32.totalorder %s3794_s27, 0  ;;  %s3266_s21 = smov [#allocation16]  }
  0xe6   : > { %2423 = vmatpush1.bf16.msra.mxu1 %v2422_v12  ;;  %v2234_v21 = vpack.c.bf16 %v508_v19, %v504_v18  ;;  %2233 = vmatprep.subr.bf16.mxu0 %v2232_v16  ;;  %v2426_v25 = vpack.c.bf16 %v510_v22, %v506_v20  ;;  %v2236_v26 = vpack.c.bf16 %v517_v24, %v513_v23  ;;  %v515_v27 = vld [vmem:[#allocation6 + $0x98] sm:$0xff]  ;;  %v512_v29 = vld [vmem:[#allocation6 + $0x80] sm:$0xff]  ;;  %v514_v32 = vld [vmem:[#allocation6 + $0x90] sm:$0xff]  ;;  %s488_s26 = scalar_lea.vmem %s3769_s1, %s2824_s3  ;;  %s3169_s19 = sshll.u32 %s3266_s21, 4  ;;  %s3170_s19 = int_to_ptr.vmem [resolvable:$false] %s3169_s19 }
  0xe7   : > { %2425 = vmatprep.subr.bf16.mxu1 %v2424_v17  ;;  %v519_v28 = vld [vmem:[#allocation6 + $0xb8] sm:$0xff]  ;;  %v516_v31 = vld [vmem:[#allocation6 + $0xa0] sm:$0xff]  ;;  %v518_v33 = vld [vmem:[#allocation6 + $0xb0] sm:$0xff]  ;;  %s3171_s13 = scalar_lea.vmem %s3170_s19, 32 }
  0xe8   : > { %v2428_v30 = vpack.c.bf16 %v519_v28, %v515_v27  ;;  %v2238_v34 = vpack.c.bf16 %v516_v31, %v512_v29  ;;  %v521_v35 = vld [vmem:[#allocation6 + $0xc8] sm:$0xff]  ;;  %v523_v37 = vld [vmem:[#allocation6 + $0xd8] sm:$0xff]  ;;  %v2430_v38 = vpack.c.bf16 %v518_v33, %v514_v32  ;;  %v520_v41 = vld [vmem:[#allocation6 + $0xc0] sm:$0xff] }
  0xe9   : > { %2235 = vmatpush1.bf16.msra.mxu0 %v2234_v21  ;;  %v525_v36 = vld [vmem:[#allocation6 + $0xe8] sm:$0xff]  ;;  %v527_v40 = vld [vmem:[#allocation6 + $0xf8] sm:$0xff]  ;;  %v524_v42 = vld [vmem:[#allocation6 + $0xe0] sm:$0xff] }
  0xea   : > { %2427 = vmatpush1.bf16.msra.mxu1 %v2426_v25  ;;  %2237 = vmatprep.subr.bf16.mxu0 %v2236_v26  ;;  %v2240_v39 = vpack.c.bf16 %v525_v36, %v521_v35  ;;  %v2432_v43 = vpack.c.bf16 %v527_v40, %v523_v37  ;;  %v522_v44 = vld [vmem:[#allocation6 + $0xd0] sm:$0xff]  ;;  %v529_v46 = vld [vmem:[#allocation6 + $0x108] sm:$0xff]  ;;  %v531_v48 = vld [vmem:[#allocation6 + $0x118] sm:$0xff]  ;;  %v2242_v50 = vpack.c.bf16 %v524_v42, %v520_v41 }
  0xeb   : > { %2429 = vmatprep.subr.bf16.mxu1 %v2428_v30  ;;  %v526_v45 = vld [vmem:[#allocation6 + $0xf0] sm:$0xff]  ;;  %v533_v47 = vld [vmem:[#allocation6 + $0x128] sm:$0xff]  ;;  %v535_v49 = vld [vmem:[#allocation6 + $0x138] sm:$0xff] }
  0xec   : > { %v2434_v51 = vpack.c.bf16 %v526_v45, %v522_v44  ;;  %v2244_v52 = vpack.c.bf16 %v533_v47, %v529_v46  ;;  %v528_v53 = vld [vmem:[#allocation6 + $0x100] sm:$0xff]  ;;  %v530_v55 = vld [vmem:[#allocation6 + $0x110] sm:$0xff]  ;;  %v2436_v56 = vpack.c.bf16 %v535_v49, %v531_v48  ;;  %v537_v58 = vld [vmem:[#allocation6 + $0x148] sm:$0xff] }
  0xed   : > { %2239 = vmatpush1.bf16.msra.mxu0 %v2238_v34  ;;  %v532_v54 = vld [vmem:[#allocation6 + $0x120] sm:$0xff]  ;;  %v534_v57 = vld [vmem:[#allocation6 + $0x130] sm:$0xff]  ;;  %v541_v59 = vld [vmem:[#allocation6 + $0x168] sm:$0xff] }
  0xee   : > { %2431 = vmatpush1.bf16.msra.mxu1 %v2430_v38  ;;  %2241 = vmatprep.subr.bf16.mxu0 %v2240_v39  ;;  %v539_v60 = vld [vmem:[#allocation6 + $0x158] sm:$0xff]  ;;  %v2246_v62 = vpack.c.bf16 %v532_v54, %v528_v53  ;;  %v2438_v63 = vpack.c.bf16 %v534_v57, %v530_v55  ;;  %v2248_v0 = vpack.c.bf16 %v541_v59, %v537_v58  ;;  %v536_v1 = vld [vmem:[#allocation6 + $0x140] sm:$0xff]  ;;  %v538_v3 = vld [vmem:[#allocation6 + $0x150] sm:$0xff]  ;;  %v882_v58 = vlaneseq }
  0xef   : > { %2433 = vmatprep.subr.bf16.mxu1 %v2432_v43  ;;  %v543_v61 = vld [vmem:[#allocation6 + $0x178] sm:$0xff]  ;;  %v540_v2 = vld [vmem:[#allocation6 + $0x160] sm:$0xff]  ;;  %v542_v5 = vld [vmem:[#allocation6 + $0x170] sm:$0xff] }
  0xf0   : > { %v2440_v4 = vpack.c.bf16 %v543_v61, %v539_v60  ;;  %v545_v6 = vld [vmem:[#allocation6 + $0x188] sm:$0xff]  ;;  %v547_v8 = vld [vmem:[#allocation6 + $0x198] sm:$0xff]  ;;  %v2250_v10 = vpack.c.bf16 %v540_v2, %v536_v1  ;;  %v2442_v11 = vpack.c.bf16 %v542_v5, %v538_v3  ;;  %v544_v13 = vld [vmem:[#allocation6 + $0x180] sm:$0xff] }
  0xf1   : > { %2243 = vmatpush1.bf16.msra.mxu0 %v2242_v50  ;;  %v549_v7 = vld [vmem:[#allocation6 + $0x1a8] sm:$0xff]  ;;  %v551_v9 = vld [vmem:[#allocation6 + $0x1b8] sm:$0xff]  ;;  %v548_v14 = vld [vmem:[#allocation6 + $0x1a0] sm:$0xff] }
  0xf2   : > { %2435 = vmatpush1.bf16.msra.mxu1 %v2434_v51  ;;  %2245 = vmatprep.subr.bf16.mxu0 %v2244_v52  ;;  %v2252_v12 = vpack.c.bf16 %v549_v7, %v545_v6  ;;  %v546_v15 = vld [vmem:[#allocation6 + $0x190] sm:$0xff]  ;;  %v2444_v16 = vpack.c.bf16 %v551_v9, %v547_v8  ;;  %v553_v18 = vld [vmem:[#allocation6 + $0x1c8] sm:$0xff]  ;;  %v555_v20 = vld [vmem:[#allocation6 + $0x1d8] sm:$0xff]  ;;  %v2254_v22 = vpack.c.bf16 %v548_v14, %v544_v13  ;;  %v3582_v7 = vshrl.u32 %v882_v58, 7 }
  0xf3   : > { %2437 = vmatprep.subr.bf16.mxu1 %v2436_v56  ;;  %v550_v17 = vld [vmem:[#allocation6 + $0x1b0] sm:$0xff]  ;;  %v557_v19 = vld [vmem:[#allocation6 + $0x1e8] sm:$0xff]  ;;  %v559_v21 = vld [vmem:[#allocation6 + $0x1f8] sm:$0xff] }
  0xf4   : > { %v2446_v23 = vpack.c.bf16 %v550_v17, %v546_v15  ;;  %v2256_v24 = vpack.c.bf16 %v557_v19, %v553_v18  ;;  %v552_v25 = vld [vmem:[#allocation6 + $0x1c0] sm:$0xff]  ;;  %v554_v27 = vld [vmem:[#allocation6 + $0x1d0] sm:$0xff]  ;;  %v2448_v28 = vpack.c.bf16 %v559_v21, %v555_v20  ;;  %v561_v30 = vld [vmem:[#allocation6 + $0x208] sm:$0xff]  ;;  %v494_v20 = vstv %s3576_s15 }
  0xf5   : > { %2247 = vmatpush1.bf16.msra.mxu0 %v2246_v62  ;;  %v556_v26 = vld [vmem:[#allocation6 + $0x1e0] sm:$0xff]  ;;  %v558_v29 = vld [vmem:[#allocation6 + $0x1f0] sm:$0xff]  ;;  %v565_v31 = vld [vmem:[#allocation6 + $0x228] sm:$0xff] }
  0xf6   : > { %2439 = vmatpush1.bf16.msra.mxu1 %v2438_v63  ;;  %2249 = vmatprep.subr.bf16.mxu0 %v2248_v0  ;;  %v563_v32 = vld [vmem:[#allocation6 + $0x218] sm:$0xff]  ;;  %v2258_v34 = vpack.c.bf16 %v556_v26, %v552_v25  ;;  %v2450_v35 = vpack.c.bf16 %v558_v29, %v554_v27  ;;  %v2260_v36 = vpack.c.bf16 %v565_v31, %v561_v30  ;;  %v560_v37 = vld [vmem:[#allocation6 + $0x200] sm:$0xff]  ;;  %v562_v39 = vld [vmem:[#allocation6 + $0x210] sm:$0xff] }
  0xf7   : > { %2441 = vmatprep.subr.bf16.mxu1 %v2440_v4  ;;  %v567_v33 = vld [vmem:[#allocation6 + $0x238] sm:$0xff]  ;;  %v564_v38 = vld [vmem:[#allocation6 + $0x220] sm:$0xff]  ;;  %v566_v41 = vld [vmem:[#allocation6 + $0x230] sm:$0xff] }
  0xf8   : > { %v2452_v40 = vpack.c.bf16 %v567_v33, %v563_v32  ;;  %v569_v42 = vld [vmem:[#allocation6 + $0x248] sm:$0xff]  ;;  %v571_v44 = vld [vmem:[#allocation6 + $0x258] sm:$0xff]  ;;  %v2262_v46 = vpack.c.bf16 %v564_v38, %v560_v37  ;;  %v2454_v47 = vpack.c.bf16 %v566_v41, %v562_v39  ;;  %v568_v49 = vld [vmem:[#allocation6 + $0x240] sm:$0xff] }
  0xf9   : > { %2251 = vmatpush1.bf16.msra.mxu0 %v2250_v10  ;;  %v573_v43 = vld [vmem:[#allocation6 + $0x268] sm:$0xff]  ;;  %v575_v45 = vld [vmem:[#allocation6 + $0x278] sm:$0xff]  ;;  %v572_v50 = vld [vmem:[#allocation6 + $0x260] sm:$0xff]  ;;  %v491_v10 = vstv %s3574_s29 }
  0xfa   : > { %2443 = vmatpush1.bf16.msra.mxu1 %v2442_v11  ;;  %2253 = vmatprep.subr.bf16.mxu0 %v2252_v12  ;;  %v2264_v48 = vpack.c.bf16 %v573_v43, %v569_v42  ;;  %v570_v51 = vld [vmem:[#allocation6 + $0x250] sm:$0xff]  ;;  %v2456_v52 = vpack.c.bf16 %v575_v45, %v571_v44  ;;  %v577_v54 = vld [vmem:[#allocation6 + $0x288] sm:$0xff]  ;;  %v579_v56 = vld [vmem:[#allocation6 + $0x298] sm:$0xff]  ;;  %v2266_v59 = vpack.c.bf16 %v572_v50, %v568_v49 }
  0xfb   : > { %2445 = vmatprep.subr.bf16.mxu1 %v2444_v16  ;;  %v574_v53 = vld [vmem:[#allocation6 + $0x270] sm:$0xff]  ;;  %v581_v55 = vld [vmem:[#allocation6 + $0x2a8] sm:$0xff]  ;;  %v583_v57 = vld [vmem:[#allocation6 + $0x2b8] sm:$0xff] }
  0xfc   : > { %v2458_v60 = vpack.c.bf16 %v574_v53, %v570_v51  ;;  %v2268_v61 = vpack.c.bf16 %v581_v55, %v577_v54  ;;  %v576_v62 = vld [vmem:[#allocation6 + $0x280] sm:$0xff]  ;;  %v578_v0 = vld [vmem:[#allocation6 + $0x290] sm:$0xff]  ;;  %v2460_v1 = vpack.c.bf16 %v583_v57, %v579_v56  ;;  %v585_v3 = vld [vmem:[#allocation6 + $0x2c8] sm:$0xff] }
  0xfd   : > { %2255 = vmatpush1.bf16.msra.mxu0 %v2254_v22  ;;  %v580_v63 = vld [vmem:[#allocation6 + $0x2a0] sm:$0xff]  ;;  %v582_v2 = vld [vmem:[#allocation6 + $0x2b0] sm:$0xff]  ;;  %v589_v4 = vld [vmem:[#allocation6 + $0x2e8] sm:$0xff] }
  0xfe   : > { %2447 = vmatpush1.bf16.msra.mxu1 %v2446_v23  ;;  %2257 = vmatprep.subr.bf16.mxu0 %v2256_v24  ;;  %v587_v5 = vld [vmem:[#allocation6 + $0x2d8] sm:$0xff]  ;;  %v2270_v8 = vpack.c.bf16 %v580_v63, %v576_v62  ;;  %v584_v9 = vld [vmem:[#allocation6 + $0x2c0] sm:$0xff]  ;;  %v2462_v11 = vpack.c.bf16 %v582_v2, %v578_v0  ;;  %v2272_v12 = vpack.c.bf16 %v589_v4, %v585_v3  ;;  %v586_v14 = vld [vmem:[#allocation6 + $0x2d0] sm:$0xff]  ;;  %v3587_v24 = vsub.s32 1, %v3582_v7 }
  0xff   : > { %2449 = vmatprep.subr.bf16.mxu1 %v2448_v28  ;;  %v591_v6 = vld [vmem:[#allocation6 + $0x2f8] sm:$0xff]  ;;  %v588_v13 = vld [vmem:[#allocation6 + $0x2e0] sm:$0xff]  ;;  %v590_v15 = vld [vmem:[#allocation6 + $0x2f0] sm:$0xff] }
 0x100   : > { %v2464_v16 = vpack.c.bf16 %v591_v6, %v587_v5  ;;  %v593_v17 = vld [vmem:[#allocation6 + $0x308] sm:$0xff]  ;;  %v489_v19 = vld [vmem:[%s488_s26] sm:$0x3f]  ;;  %v595_v21 = vld [vmem:[#allocation6 + $0x318] sm:$0xff]  ;;  %v2274_v25 = vpack.c.bf16 %v588_v13, %v584_v9  ;;  %v2466_v26 = vpack.c.bf16 %v590_v15, %v586_v14  ;;  %s484_s26 = scalar_lea.vmem [#allocation16], %s483_s22 }
 0x101   : > { %2259 = vmatpush1.bf16.msra.mxu0 %v2258_v34  ;;  %v597_v18 = vld [vmem:[#allocation6 + $0x328] sm:$0xff]  ;;  %v599_v22 = vld [vmem:[#allocation6 + $0x338] sm:$0xff]  ;;  %v492_v23 = vmul.f32 %v491_v10, %v489_v19  ;;  %v592_v28 = vld [vmem:[#allocation6 + $0x300] sm:$0xff]  ;;  %s1952_s23 = sshll.u32 %s484_s26, 4  ;;  %s3728_s23 = int_to_ptr.vmem [resolvable:$true] %s1952_s23 }
 0x102   : > { %2451 = vmatpush1.bf16.msra.mxu1 %v2450_v35  ;;  %2261 = vmatprep.subr.bf16.mxu0 %v2260_v36  ;;  %v2276_v27 = vpack.c.bf16 %v597_v18, %v593_v17  ;;  %v596_v29 = vld [vmem:[#allocation6 + $0x320] sm:$0xff]  ;;  %v594_v30 = vld [vmem:[#allocation6 + $0x310] sm:$0xff]  ;;  %v2468_v32 = vpack.c.bf16 %v599_v22, %v595_v21  ;;  %v601_v34 = vld [vmem:[#allocation6 + $0x348] sm:$0xff]  ;;  %s3165_s12 = scalar_lea.vmem %s3728_s23, 16  ;;  %p3172_p0 = scmp.lt.s32.totalorder %s3728_s23, %s3170_s19 }
 0x103   : > { %2453 = vmatprep.subr.bf16.mxu1 %v2452_v40  ;;  %v3589_v31 = vadd.f32 %v494_v20, %v492_v23  ;;  %v598_v33 = vld [vmem:[#allocation6 + $0x330] sm:$0xff]  ;;  %v605_v35 = vld [vmem:[#allocation6 + $0x368] sm:$0xff]  ;;  %v603_v36 = vld [vmem:[#allocation6 + $0x358] sm:$0xff]  ;;  %v2278_v39 = vpack.c.bf16 %v596_v29, %v592_v28  ;;  %v896_v23 = vsub.s32 3, %v3582_v7  ;;  %v904_v28 = vsub.s32 5, %v3582_v7  ;;  %p3166_p10 = scmp.ne.s32.totalorder %s3728_s23, %s3165_s12  ;;  %p3173_p7 = scmp.lt.s32.totalorder %s3171_s13, %s3165_s12 }
 0x104   : > { %v607_v37 = vld [vmem:[#allocation6 + $0x378] sm:$0xff]  ;;  %v2470_v40 = vpack.c.bf16 %v598_v33, %v594_v30  ;;  %v2280_v41 = vpack.c.bf16 %v605_v35, %v601_v34  ;;  %v600_v42 = vld [vmem:[#allocation6 + $0x340] sm:$0xff]  ;;  %v602_v44 = vld [vmem:[#allocation6 + $0x350] sm:$0xff]  ;;  %v900_v30 = vsub.s32 4, %v3582_v7 }
 0x105   : > { %2263 = vmatpush1.bf16.msra.mxu0 %v2262_v46  ;;  %v889_v38 = vrot.slane %v3589_v31, %v3587_v24  ;;  %v604_v43 = vld [vmem:[#allocation6 + $0x360] sm:$0xff]  ;;  %v2472_v45 = vpack.c.bf16 %v607_v37, %v603_v36  ;;  %v606_v46 = vld [vmem:[#allocation6 + $0x370] sm:$0xff]  ;;  %v611_v49 = vld [vmem:[#allocation6 + $0x398] sm:$0xff]  ;;  %v3602_v37 = vrot.slane %v3589_v31, %v904_v28  ;;  %p3167_p3 = pnand %p3166_p10, %p3814_p2  ;;  %p3174_p8 = por %p3173_p7, %p3172_p0 }
 0x106   : > { %2455 = vmatpush1.bf16.msra.mxu1 %v2454_v47  ;;  %2265 = vmatprep.subr.bf16.mxu0 %v2264_v48  ;;  %v609_v47 = vld [vmem:[#allocation6 + $0x388] sm:$0xff]  ;;  %v615_v50 = vld [vmem:[#allocation6 + $0x3b8] sm:$0xff]  ;;  %v2282_v51 = vpack.c.bf16 %v604_v43, %v600_v42  ;;  %v608_v54 = vld [vmem:[#allocation6 + $0x380] sm:$0xff]  ;;  %v897_v42 = vrot.slane %v3589_v31, %v896_v23  ;;  %v3608_v43 = vrot.slane %v3589_v31, %v900_v30 }
 0x107   : > { %2457 = vmatprep.subr.bf16.mxu1 %v2456_v52  ;;  %v613_v48 = vld [vmem:[#allocation6 + $0x3a8] sm:$0xff]  ;;  %997 = vmatprep.mubr.f32.mxu0 %v889_v38  ;;  %v2474_v52 = vpack.c.bf16 %v606_v46, %v602_v44  ;;  %v612_v55 = vld [vmem:[#allocation6 + $0x3a0] sm:$0xff]  ;;  %v610_v56 = vld [vmem:[#allocation6 + $0x390] sm:$0xff]  ;;  %v2476_v57 = vpack.c.bf16 %v615_v50, %v611_v49  ;;  %p3168_p4 = pneg %p3167_p3 }
 0x108   : > { %1210 = vmatprep.mubr.f32.mxu1 %v889_v38  ;;  %v2284_v53 = vpack.c.bf16 %v613_v48, %v609_v47  ;;  %v614_v58 = vld [vmem:[#allocation6 + $0x3b0] sm:$0xff]  ;;  %v623_v62 = vld [vmem:[#allocation6 + $0x3f8] sm:$0xff]  ;;  %v2286_v63 = vpack.c.bf16 %v612_v55, %v608_v54  ;;  %v616_v2 = vld [vmem:[#allocation6 + $0x3c0] sm:$0xff] }
 0x109   : > { %2267 = vmatpush1.bf16.msra.mxu0 %v2266_v59  ;;  %v617_v59 = vld [vmem:[#allocation6 + $0x3c8] sm:$0xff]  ;;  %v2478_v0 = vpack.c.bf16 %v614_v58, %v610_v56  ;;  %v620_v3 = vld [vmem:[#allocation6 + $0x3e0] sm:$0xff]  ;;  %v618_v4 = vld [vmem:[#allocation6 + $0x3d0] sm:$0xff]  ;;  %p3175_p11 = pnand %p3174_p8, %p3168_p4 }
 0x10a   : > { %2459 = vmatpush1.bf16.msra.mxu1 %v2458_v60  ;;  %2269 = vmatprep.subr.bf16.mxu0 %v2268_v61  ;;  %v621_v60 = vld [vmem:[#allocation6 + $0x3e8] sm:$0xff]  ;;  %v619_v61 = vld [vmem:[#allocation6 + $0x3d8] sm:$0xff]  ;;  %v622_v6 = vld [vmem:[#allocation6 + $0x3f0] sm:$0xff]  ;;  %v2290_v13 = vpack.c.bf16 %v620_v3, %v616_v2 }
 0x10b   : > { %2461 = vmatprep.subr.bf16.mxu1 %v2460_v1  ;;  %v2288_v1 = vpack.c.bf16 %v621_v60, %v617_v59  ;;  %v2480_v5 = vpack.c.bf16 %v623_v62, %v619_v61  ;;  %v629_v9 = vld [vmem:[#allocation6 + $0x428] sm:$0xff]  ;;  %v627_v10 = vld [vmem:[#allocation6 + $0x418] sm:$0xff]  ;;  %v2482_v14 = vpack.c.bf16 %v622_v6, %v618_v4  ;;  %v628_v17 = vld [vmem:[#allocation6 + $0x420] sm:$0xff] }
 0x10c   : > { %v626_v18 = vld [vmem:[#allocation6 + $0x410] sm:$0xff]  ;;  %v633_v21 = vld [vmem:[#allocation6 + $0x448] sm:$0xff]  ;;  %v632_v34 = vld [vmem:[#allocation6 + $0x440] sm:$0xff] }
 0x10d   : > { %2271 = vmatpush1.bf16.msra.mxu0 %v2270_v8  ;;  %v625_v8 = vld [vmem:[#allocation6 + $0x408] sm:$0xff]  ;;  %v630_v20 = vld [vmem:[#allocation6 + $0x430] sm:$0xff]  ;;  %v636_v35 = vld [vmem:[#allocation6 + $0x460] sm:$0xff] }
 0x10e   : > { %2463 = vmatpush1.bf16.msra.mxu1 %v2462_v11  ;;  %2273 = vmatprep.subr.bf16.mxu0 %v2272_v12  ;;  %v631_v11 = vld [vmem:[#allocation6 + $0x438] sm:$0xff]  ;;  %v3594_v12 = vsub.s32 0, %v3582_v7  ;;  %v2292_v15 = vpack.c.bf16 %v629_v9, %v625_v8  ;;  %v637_v22 = vld [vmem:[#allocation6 + $0x468] sm:$0xff]  ;;  %v634_v36 = vld [vmem:[#allocation6 + $0x450] sm:$0xff]  ;;  %v2298_v46 = vpack.c.bf16 %v636_v35, %v632_v34 }
 0x10f   : > { %2465 = vmatprep.subr.bf16.mxu1 %v2464_v16  ;;  %v624_v16 = vld [vmem:[#allocation6 + $0x400] sm:$0xff]  ;;  %v2484_v19 = vpack.c.bf16 %v631_v11, %v627_v10  ;;  %v2296_v33 = vpack.c.bf16 %v637_v22, %v633_v21  ;;  %v643_v44 = vld [vmem:[#allocation6 + $0x498] sm:$0xff]  ;;  %v649_v54 = vld [vmem:[#allocation6 + $0x4c8] sm:$0xff] }
 0x110   : > { %v2294_v29 = vpack.c.bf16 %v628_v17, %v624_v16  ;;  %v640_v49 = vld [vmem:[#allocation6 + $0x480] sm:$0xff]  ;;  %v653_v55 = vld [vmem:[#allocation6 + $0x4e8] sm:$0xff]  ;;  %v651_v56 = vld [vmem:[#allocation6 + $0x4d8] sm:$0xff] }
 0x111   : > { %2275 = vmatpush1.bf16.msra.mxu0 %v2274_v25  ;;  %v885_v25 = vrot.slane %v3589_v31, %v3594_v12  ;;  %v644_v50 = vld [vmem:[#allocation6 + $0x4a0] sm:$0xff]  ;;  %v2304_v60 = vpack.c.bf16 %v653_v55, %v649_v54  ;;  %v657_v2 = vld [vmem:[#allocation6 + $0x508] sm:$0xff]  ;;  %v659_v4 = vld [vmem:[#allocation6 + $0x518] sm:$0xff] }
 0x112   : > { %2467 = vmatpush1.bf16.msra.mxu1 %v2466_v26  ;;  %2277 = vmatprep.subr.bf16.mxu0 %v2276_v27  ;;  %v635_v26 = vld [vmem:[#allocation6 + $0x458] sm:$0xff]  ;;  %v2302_v58 = vpack.c.bf16 %v644_v50, %v640_v49  ;;  %v648_v61 = vld [vmem:[#allocation6 + $0x4c0] sm:$0xff]  ;;  %v661_v3 = vld [vmem:[#allocation6 + $0x528] sm:$0xff] }
 0x113   : > { %2469 = vmatprep.subr.bf16.mxu1 %v2468_v32  ;;  %v639_v27 = vld [vmem:[#allocation6 + $0x478] sm:$0xff]  ;;  %v2486_v32 = vpack.c.bf16 %v630_v20, %v626_v18  ;;  %v652_v62 = vld [vmem:[#allocation6 + $0x4e0] sm:$0xff]  ;;  %v2308_v9 = vpack.c.bf16 %v661_v3, %v657_v2  ;;  %v665_v16 = vld [vmem:[#allocation6 + $0x548] sm:$0xff] }
 0x114   : > { %v2488_v38 = vpack.c.bf16 %v639_v27, %v635_v26  ;;  %v2306_v6 = vpack.c.bf16 %v652_v62, %v648_v61  ;;  %v656_v10 = vld [vmem:[#allocation6 + $0x500] sm:$0xff]  ;;  %v669_v17 = vld [vmem:[#allocation6 + $0x568] sm:$0xff]  ;;  %v667_v18 = vld [vmem:[#allocation6 + $0x558] sm:$0xff] }
 0x115   : > { %2279 = vmatpush1.bf16.msra.mxu0 %v2278_v39  ;;  %v638_v39 = vld [vmem:[#allocation6 + $0x470] sm:$0xff]  ;;  %v660_v11 = vld [vmem:[#allocation6 + $0x520] sm:$0xff]  ;;  %v2312_v22 = vpack.c.bf16 %v669_v17, %v665_v16  ;;  %v673_v30 = vld [vmem:[#allocation6 + $0x588] sm:$0xff] }
 0x116   : > { %2471 = vmatpush1.bf16.msra.mxu1 %v2470_v40  ;;  %2281 = vmatprep.subr.bf16.mxu0 %v2280_v41  ;;  %v641_v40 = vld [vmem:[#allocation6 + $0x488] sm:$0xff]  ;;  %v2490_v47 = vpack.c.bf16 %v638_v39, %v634_v36  ;;  %v2310_v20 = vpack.c.bf16 %v660_v11, %v656_v10  ;;  %v668_v26 = vld [vmem:[#allocation6 + $0x560] sm:$0xff]  ;;  %v666_v27 = vld [vmem:[#allocation6 + $0x550] sm:$0xff] }
 0x117   : > { %2473 = vmatprep.subr.bf16.mxu1 %v2472_v45  ;;  %v645_v41 = vld [vmem:[#allocation6 + $0x4a8] sm:$0xff]  ;;  %v647_v45 = vld [vmem:[#allocation6 + $0x4b8] sm:$0xff]  ;;  %v672_v39 = vld [vmem:[#allocation6 + $0x580] sm:$0xff] }
 0x118   : > { %v2300_v48 = vpack.c.bf16 %v645_v41, %v641_v40  ;;  %v679_v34 = vld [vmem:[#allocation6 + $0x5b8] sm:$0xff]  ;;  %v676_v40 = vld [vmem:[#allocation6 + $0x5a0] sm:$0xff]  ;;  %v674_v41 = vld [vmem:[#allocation6 + $0x590] sm:$0xff] }
 0x119   : > { %2283 = vmatpush1.bf16.msra.mxu0 %v2282_v51  ;;  %v642_v51 = vld [vmem:[#allocation6 + $0x490] sm:$0xff]  ;;  %v2318_v49 = vpack.c.bf16 %v676_v40, %v672_v39 }
 0x11a   : > { %2475 = vmatpush1.bf16.msra.mxu1 %v2474_v52  ;;  %2285 = vmatprep.subr.bf16.mxu0 %v2284_v53  ;;  %v2492_v52 = vpack.c.bf16 %v647_v45, %v643_v44  ;;  %v646_v53 = vld [vmem:[#allocation6 + $0x4b0] sm:$0xff]  ;;  %v681_v45 = vld [vmem:[#allocation6 + $0x5c8] sm:$0xff] }
 0x11b   : > { %2477 = vmatprep.subr.bf16.mxu1 %v2476_v57  ;;  %v655_v57 = vld [vmem:[#allocation6 + $0x4f8] sm:$0xff]  ;;  %v2494_v59 = vpack.c.bf16 %v646_v53, %v642_v51  ;;  %v678_v44 = vld [vmem:[#allocation6 + $0x5b0] sm:$0xff]  ;;  %v684_v53 = vld [vmem:[#allocation6 + $0x5e0] sm:$0xff] }
 0x11c   : > { %v2510_v50 = vpack.c.bf16 %v678_v44, %v674_v41  ;;  %v682_v54 = vld [vmem:[#allocation6 + $0x5d0] sm:$0xff]  ;;  %v716_v44 = vld [vmem:[#allocation6 + $0x6e0] sm:$0xff] }
 0x11d   : > { %2287 = vmatpush1.bf16.msra.mxu0 %v2286_v63  ;;  %v650_v63 = vld [vmem:[#allocation6 + $0x4d0] sm:$0xff] }
 0x11e   : > { %2479 = vmatpush1.bf16.msra.mxu1 %v2478_v0  ;;  %2289 = vmatprep.subr.bf16.mxu0 %v2288_v1  ;;  %v2496_v0 = vpack.c.bf16 %v655_v57, %v651_v56  ;;  %v654_v1 = vld [vmem:[#allocation6 + $0x4f0] sm:$0xff]  ;;  %v689_v57 = vld [vmem:[#allocation6 + $0x608] sm:$0xff] }
 0x11f   : > { %2481 = vmatprep.subr.bf16.mxu1 %v2480_v5  ;;  %v663_v5 = vld [vmem:[#allocation6 + $0x538] sm:$0xff]  ;;  %v2498_v8 = vpack.c.bf16 %v654_v1, %v650_v63  ;;  %v686_v56 = vld [vmem:[#allocation6 + $0x5f0] sm:$0xff]  ;;  %v692_v1 = vld [vmem:[#allocation6 + $0x620] sm:$0xff] }
 0x120   : > { %v2514_v62 = vpack.c.bf16 %v686_v56, %v682_v54  ;;  %v690_v2 = vld [vmem:[#allocation6 + $0x610] sm:$0xff]  ;;  %v724_v56 = vld [vmem:[#allocation6 + $0x720] sm:$0xff] }
 0x121   : > { %2291 = vmatpush1.bf16.msra.mxu0 %v2290_v13  ;;  %v658_v13 = vld [vmem:[#allocation6 + $0x510] sm:$0xff] }
 0x122   : > { %2483 = vmatpush1.bf16.msra.mxu1 %v2482_v14  ;;  %2293 = vmatprep.subr.bf16.mxu0 %v2292_v15  ;;  %v2500_v14 = vpack.c.bf16 %v663_v5, %v659_v4  ;;  %v662_v15 = vld [vmem:[#allocation6 + $0x530] sm:$0xff]  ;;  %v697_v5 = vld [vmem:[#allocation6 + $0x648] sm:$0xff] }
 0x123   : > { %2485 = vmatprep.subr.bf16.mxu1 %v2484_v19  ;;  %v671_v19 = vld [vmem:[#allocation6 + $0x578] sm:$0xff]  ;;  %v2502_v21 = vpack.c.bf16 %v662_v15, %v658_v13  ;;  %v694_v4 = vld [vmem:[#allocation6 + $0x630] sm:$0xff]  ;;  %v700_v15 = vld [vmem:[#allocation6 + $0x660] sm:$0xff] }
 0x124   : > { %998 = vmatmul.mubr.f32.vlgmr.msra.gmra.mrb[0].mxu0 %v885_v25  ;;  %v2504_v28 = vpack.c.bf16 %v671_v19, %v667_v18  ;;  %v2518_v11 = vpack.c.bf16 %v694_v4, %v690_v2  ;;  %v698_v16 = vld [vmem:[#allocation6 + $0x650] sm:$0xff]  ;;  %v705_v19 = vld [vmem:[#allocation6 + $0x688] sm:$0xff]  ;;  %v732_v4 = vld [vmem:[#allocation6 + $0x760] sm:$0xff] }
 0x125   : > { %2295 = vmatpush1.bf16.msra.mxu0 %v2294_v29  ;;  %1211 = vmatmul.mubr.f32.vlgmr.msra.gmra.mrb[0].mxu1 %v885_v25  ;;  %v664_v25 = vld [vmem:[#allocation6 + $0x540] sm:$0xff]  ;;  %v670_v29 = vld [vmem:[#allocation6 + $0x570] sm:$0xff] }
 0x126   : > { %2487 = vmatpush1.bf16.msra.mxu1 %v2486_v32  ;;  %2297 = vmatprep.subr.bf16.mxu0 %v2296_v33  ;;  %v677_v32 = vld [vmem:[#allocation6 + $0x5a8] sm:$0xff]  ;;  %v675_v33 = vld [vmem:[#allocation6 + $0x598] sm:$0xff]  ;;  %v2314_v35 = vpack.c.bf16 %v668_v26, %v664_v25  ;;  %v2506_v36 = vpack.c.bf16 %v670_v29, %v666_v27  ;;  %v702_v18 = vld [vmem:[#allocation6 + $0x670] sm:$0xff] }
 0x127   : > { %2489 = vmatprep.subr.bf16.mxu1 %v2488_v38  ;;  %1068 = vmatprep.mubr.f32.mxu0 %v897_v42  ;;  %v2316_v38 = vpack.c.bf16 %v677_v32, %v673_v30  ;;  %v2522_v26 = vpack.c.bf16 %v702_v18, %v698_v16  ;;  %v708_v29 = vld [vmem:[#allocation6 + $0x6a0] sm:$0xff]  ;;  %v706_v30 = vld [vmem:[#allocation6 + $0x690] sm:$0xff] }
 0x128   : > { %1281 = vmatprep.mubr.f32.mxu1 %v897_v42  ;;  %v2508_v42 = vpack.c.bf16 %v679_v34, %v675_v33  ;;  %v710_v33 = vld [vmem:[#allocation6 + $0x6b0] sm:$0xff]  ;;  %v713_v34 = vld [vmem:[#allocation6 + $0x6c8] sm:$0xff]  ;;  %v740_v18 = vld [vmem:[#allocation6 + $0x7a0] sm:$0xff] }
 0x129   : > { %2299 = vmatpush1.bf16.msra.mxu0 %v2298_v46  ;;  %v685_v46 = vld [vmem:[#allocation6 + $0x5e8] sm:$0xff]  ;;  %v2526_v40 = vpack.c.bf16 %v710_v33, %v706_v30  ;;  %v748_v33 = vld [vmem:[#allocation6 + $0x7e0] sm:$0xff] }
 0x12a   : > { %2491 = vmatpush1.bf16.msra.mxu1 %v2490_v47  ;;  %2301 = vmatprep.subr.bf16.mxu0 %v2300_v48  ;;  %v683_v47 = vld [vmem:[#allocation6 + $0x5d8] sm:$0xff]  ;;  %v2320_v51 = vpack.c.bf16 %v685_v46, %v681_v45  ;;  %v714_v45 = vld [vmem:[#allocation6 + $0x6d0] sm:$0xff] }
 0x12b   : > { %2493 = vmatprep.subr.bf16.mxu1 %v2492_v52  ;;  %v687_v48 = vld [vmem:[#allocation6 + $0x5f8] sm:$0xff]  ;;  %v680_v52 = vld [vmem:[#allocation6 + $0x5c0] sm:$0xff] }
 0x12c   : > { %v2512_v55 = vpack.c.bf16 %v687_v48, %v683_v47  ;;  %v2322_v61 = vpack.c.bf16 %v684_v53, %v680_v52  ;;  %v718_v47 = vld [vmem:[#allocation6 + $0x6f0] sm:$0xff]  ;;  %v721_v48 = vld [vmem:[#allocation6 + $0x708] sm:$0xff] }
 0x12d   : > { %2303 = vmatpush1.bf16.msra.mxu0 %v2302_v58  ;;  %v693_v58 = vld [vmem:[#allocation6 + $0x628] sm:$0xff]  ;;  %v2530_v53 = vpack.c.bf16 %v718_v47, %v714_v45  ;;  %v752_v47 = vld [vmem:[#allocation6 + $0x800] sm:$0xff] }
 0x12e   : > { %2495 = vmatpush1.bf16.msra.mxu1 %v2494_v59  ;;  %2305 = vmatprep.subr.bf16.mxu0 %v2304_v60  ;;  %v691_v59 = vld [vmem:[#allocation6 + $0x618] sm:$0xff]  ;;  %v2324_v63 = vpack.c.bf16 %v693_v58, %v689_v57  ;;  %v722_v57 = vld [vmem:[#allocation6 + $0x710] sm:$0xff] }
 0x12f   : > { %2497 = vmatprep.subr.bf16.mxu1 %v2496_v0  ;;  %v695_v60 = vld [vmem:[#allocation6 + $0x638] sm:$0xff]  ;;  %v688_v0 = vld [vmem:[#allocation6 + $0x600] sm:$0xff] }
 0x130   : > { %v2516_v3 = vpack.c.bf16 %v695_v60, %v691_v59  ;;  %v2326_v10 = vpack.c.bf16 %v692_v1, %v688_v0  ;;  %v726_v59 = vld [vmem:[#allocation6 + $0x730] sm:$0xff]  ;;  %v729_v60 = vld [vmem:[#allocation6 + $0x748] sm:$0xff] }
 0x131   : > { %2307 = vmatpush1.bf16.msra.mxu0 %v2306_v6  ;;  %v701_v6 = vld [vmem:[#allocation6 + $0x668] sm:$0xff]  ;;  %v2534_v1 = vpack.c.bf16 %v726_v59, %v722_v57 }
 0x132   : > { %2499 = vmatpush1.bf16.msra.mxu1 %v2498_v8  ;;  %2309 = vmatprep.subr.bf16.mxu0 %v2308_v9  ;;  %v699_v8 = vld [vmem:[#allocation6 + $0x658] sm:$0xff]  ;;  %v2328_v13 = vpack.c.bf16 %v701_v6, %v697_v5  ;;  %v730_v5 = vld [vmem:[#allocation6 + $0x750] sm:$0xff] }
 0x133   : > { %2501 = vmatprep.subr.bf16.mxu1 %v2500_v14  ;;  %v703_v9 = vld [vmem:[#allocation6 + $0x678] sm:$0xff]  ;;  %v696_v14 = vld [vmem:[#allocation6 + $0x640] sm:$0xff] }
 0x134   : > { %v2520_v17 = vpack.c.bf16 %v703_v9, %v699_v8  ;;  %v2330_v25 = vpack.c.bf16 %v700_v15, %v696_v14  ;;  %v734_v8 = vld [vmem:[#allocation6 + $0x770] sm:$0xff]  ;;  %v737_v9 = vld [vmem:[#allocation6 + $0x788] sm:$0xff] }
 0x135   : > { %2311 = vmatpush1.bf16.msra.mxu0 %v2310_v20  ;;  %v709_v20 = vld [vmem:[#allocation6 + $0x6a8] sm:$0xff]  ;;  %v2538_v15 = vpack.c.bf16 %v734_v8, %v730_v5  ;;  %v768_v8 = vld [vmem:[#allocation6 + $0x880] sm:$0xff] }
 0x136   : > { %2503 = vmatpush1.bf16.msra.mxu1 %v2502_v21  ;;  %2313 = vmatprep.subr.bf16.mxu0 %v2312_v22  ;;  %v707_v21 = vld [vmem:[#allocation6 + $0x698] sm:$0xff]  ;;  %v2332_v27 = vpack.c.bf16 %v709_v20, %v705_v19  ;;  %v738_v19 = vld [vmem:[#allocation6 + $0x790] sm:$0xff] }
 0x137   : > { %2505 = vmatprep.subr.bf16.mxu1 %v2504_v28  ;;  %v711_v22 = vld [vmem:[#allocation6 + $0x6b8] sm:$0xff]  ;;  %v704_v28 = vld [vmem:[#allocation6 + $0x680] sm:$0xff] }
 0x138   : > { %v2524_v32 = vpack.c.bf16 %v711_v22, %v707_v21  ;;  %v2334_v39 = vpack.c.bf16 %v708_v29, %v704_v28  ;;  %v742_v21 = vld [vmem:[#allocation6 + $0x7b0] sm:$0xff]  ;;  %v745_v22 = vld [vmem:[#allocation6 + $0x7c8] sm:$0xff] }
 0x139   : > { %2315 = vmatpush1.bf16.msra.mxu0 %v2314_v35  ;;  %v717_v35 = vld [vmem:[#allocation6 + $0x6e8] sm:$0xff]  ;;  %v2542_v29 = vpack.c.bf16 %v742_v21, %v738_v19  ;;  %v776_v21 = vld [vmem:[#allocation6 + $0x8c0] sm:$0xff] }
 0x13a   : > { %2507 = vmatpush1.bf16.msra.mxu1 %v2506_v36  ;;  %2317 = vmatprep.subr.bf16.mxu0 %v2316_v38  ;;  %v715_v36 = vld [vmem:[#allocation6 + $0x6d8] sm:$0xff]  ;;  %v2336_v41 = vpack.c.bf16 %v717_v35, %v713_v34  ;;  %v746_v34 = vld [vmem:[#allocation6 + $0x7d0] sm:$0xff] }
 0x13b   : > { %2509 = vmatprep.subr.bf16.mxu1 %v2508_v42  ;;  %v719_v38 = vld [vmem:[#allocation6 + $0x6f8] sm:$0xff]  ;;  %v712_v42 = vld [vmem:[#allocation6 + $0x6c0] sm:$0xff] }
 0x13c   : > { %v2528_v46 = vpack.c.bf16 %v719_v38, %v715_v36  ;;  %v2338_v52 = vpack.c.bf16 %v716_v44, %v712_v42  ;;  %v750_v36 = vld [vmem:[#allocation6 + $0x7f0] sm:$0xff]  ;;  %v753_v38 = vld [vmem:[#allocation6 + $0x808] sm:$0xff]  ;;  %v892_v42 = vsub.s32 2, %v3582_v7 }
 0x13d   : > { %2319 = vmatpush1.bf16.msra.mxu0 %v2318_v49  ;;  %v725_v49 = vld [vmem:[#allocation6 + $0x728] sm:$0xff]  ;;  %v2546_v45 = vpack.c.bf16 %v750_v36, %v746_v34  ;;  %v788_v36 = vld [vmem:[#allocation6 + $0x920] sm:$0xff] }
 0x13e   : > { %2511 = vmatpush1.bf16.msra.mxu1 %v2510_v50  ;;  %2321 = vmatprep.subr.bf16.mxu0 %v2320_v51  ;;  %v723_v50 = vld [vmem:[#allocation6 + $0x718] sm:$0xff]  ;;  %v2340_v54 = vpack.c.bf16 %v725_v49, %v721_v48  ;;  %v756_v48 = vld [vmem:[#allocation6 + $0x820] sm:$0xff]  ;;  %v754_v49 = vld [vmem:[#allocation6 + $0x810] sm:$0xff] }
 0x13f   : > { %2513 = vmatprep.subr.bf16.mxu1 %v2512_v55  ;;  %v727_v51 = vld [vmem:[#allocation6 + $0x738] sm:$0xff]  ;;  %v720_v55 = vld [vmem:[#allocation6 + $0x700] sm:$0xff]  ;;  %v2358_v57 = vpack.c.bf16 %v756_v48, %v752_v47 }
 0x140   : > { %v2532_v58 = vpack.c.bf16 %v727_v51, %v723_v50  ;;  %v2342_v0 = vpack.c.bf16 %v724_v56, %v720_v55  ;;  %v758_v51 = vld [vmem:[#allocation6 + $0x830] sm:$0xff]  ;;  %v763_v55 = vld [vmem:[#allocation6 + $0x858] sm:$0xff]  ;;  %v1687_v7 = vld [vmem:[#allocation12 + $0xe0] sm:$0xff] }
 0x141   : > { %2323 = vmatpush1.bf16.msra.mxu0 %v2322_v61  ;;  %v733_v61 = vld [vmem:[#allocation6 + $0x768] sm:$0xff]  ;;  %v767_v56 = vld [vmem:[#allocation6 + $0x878] sm:$0xff] }
 0x142   : > { %2515 = vmatpush1.bf16.msra.mxu1 %v2514_v62  ;;  %2325 = vmatprep.subr.bf16.mxu0 %v2324_v63  ;;  %v731_v62 = vld [vmem:[#allocation6 + $0x758] sm:$0xff]  ;;  %v2344_v2 = vpack.c.bf16 %v733_v61, %v729_v60  ;;  %v760_v60 = vld [vmem:[#allocation6 + $0x840] sm:$0xff] }
 0x143   : > { %2517 = vmatprep.subr.bf16.mxu1 %v2516_v3  ;;  %v735_v63 = vld [vmem:[#allocation6 + $0x778] sm:$0xff]  ;;  %v728_v3 = vld [vmem:[#allocation6 + $0x740] sm:$0xff] }
 0x144   : > { %v2536_v6 = vpack.c.bf16 %v735_v63, %v731_v62  ;;  %v2346_v14 = vpack.c.bf16 %v732_v4, %v728_v3  ;;  %v764_v61 = vld [vmem:[#allocation6 + $0x860] sm:$0xff]  ;;  %v762_v62 = vld [vmem:[#allocation6 + $0x850] sm:$0xff]  ;;  %v2552_v63 = vpack.c.bf16 %v767_v56, %v763_v55  ;;  %v771_v3 = vld [vmem:[#allocation6 + $0x898] sm:$0xff] }
 0x145   : > { %2327 = vmatpush1.bf16.msra.mxu0 %v2326_v10  ;;  %v741_v10 = vld [vmem:[#allocation6 + $0x7a8] sm:$0xff]  ;;  %v775_v4 = vld [vmem:[#allocation6 + $0x8b8] sm:$0xff] }
 0x146   : > { %2519 = vmatpush1.bf16.msra.mxu1 %v2518_v11  ;;  %2329 = vmatprep.subr.bf16.mxu0 %v2328_v13  ;;  %v739_v11 = vld [vmem:[#allocation6 + $0x798] sm:$0xff]  ;;  %v2348_v16 = vpack.c.bf16 %v741_v10, %v737_v9  ;;  %v772_v9 = vld [vmem:[#allocation6 + $0x8a0] sm:$0xff]  ;;  %v770_v10 = vld [vmem:[#allocation6 + $0x890] sm:$0xff] }
 0x147   : > { %2521 = vmatprep.subr.bf16.mxu1 %v2520_v17  ;;  %v743_v13 = vld [vmem:[#allocation6 + $0x7b8] sm:$0xff]  ;;  %v736_v17 = vld [vmem:[#allocation6 + $0x780] sm:$0xff]  ;;  %v801_v55 = vld [vmem:[#allocation6 + $0x988] sm:$0xff] }
 0x148   : > { %v2540_v20 = vpack.c.bf16 %v743_v13, %v739_v11  ;;  %v2350_v28 = vpack.c.bf16 %v740_v18, %v736_v17  ;;  %v2556_v11 = vpack.c.bf16 %v775_v4, %v771_v3  ;;  %v774_v13 = vld [vmem:[#allocation6 + $0x8b0] sm:$0xff]  ;;  %v783_v17 = vld [vmem:[#allocation6 + $0x8f8] sm:$0xff]  ;;  %v2366_v18 = vpack.c.bf16 %v772_v9, %v768_v8  ;;  %v805_v56 = vld [vmem:[#allocation6 + $0x9a8] sm:$0xff] }
 0x149   : > { %2331 = vmatpush1.bf16.msra.mxu0 %v2330_v25  ;;  %v749_v25 = vld [vmem:[#allocation6 + $0x7e8] sm:$0xff]  ;;  %v2558_v19 = vpack.c.bf16 %v774_v13, %v770_v10  ;;  %v808_v10 = vld [vmem:[#allocation6 + $0x9c0] sm:$0xff]  ;;  %v810_v13 = vld [vmem:[#allocation6 + $0x9d0] sm:$0xff] }
 0x14a   : > { %2523 = vmatpush1.bf16.msra.mxu1 %v2522_v26  ;;  %2333 = vmatprep.subr.bf16.mxu0 %v2332_v27  ;;  %v747_v26 = vld [vmem:[#allocation6 + $0x7d8] sm:$0xff]  ;;  %v2352_v30 = vpack.c.bf16 %v749_v25, %v745_v22  ;;  %v780_v22 = vld [vmem:[#allocation6 + $0x8e0] sm:$0xff]  ;;  %v778_v25 = vld [vmem:[#allocation6 + $0x8d0] sm:$0xff] }
 0x14b   : > { %2525 = vmatprep.subr.bf16.mxu1 %v2524_v32  ;;  %v751_v27 = vld [vmem:[#allocation6 + $0x7f8] sm:$0xff]  ;;  %v744_v32 = vld [vmem:[#allocation6 + $0x7c0] sm:$0xff]  ;;  %v809_v3 = vld [vmem:[#allocation6 + $0x9c8] sm:$0xff] }
 0x14c   : > { %v2544_v35 = vpack.c.bf16 %v751_v27, %v747_v26  ;;  %v2354_v44 = vpack.c.bf16 %v748_v33, %v744_v32  ;;  %v782_v27 = vld [vmem:[#allocation6 + $0x8f0] sm:$0xff]  ;;  %v791_v32 = vld [vmem:[#allocation6 + $0x938] sm:$0xff]  ;;  %v2370_v33 = vpack.c.bf16 %v780_v22, %v776_v21  ;;  %v813_v4 = vld [vmem:[#allocation6 + $0x9e8] sm:$0xff] }
 0x14d   : > { %2335 = vmatpush1.bf16.msra.mxu0 %v2334_v39  ;;  %v757_v39 = vld [vmem:[#allocation6 + $0x828] sm:$0xff]  ;;  %v2384_v9 = vpack.c.bf16 %v813_v4, %v809_v3  ;;  %v846_v4 = vld [vmem:[#allocation6 + $0xaf0] sm:$0xff] }
 0x14e   : > { %2527 = vmatpush1.bf16.msra.mxu1 %v2526_v40  ;;  %2337 = vmatprep.subr.bf16.mxu0 %v2336_v41  ;;  %v755_v40 = vld [vmem:[#allocation6 + $0x818] sm:$0xff] }
 0x14f   : > { %2529 = vmatprep.subr.bf16.mxu1 %v2528_v46  ;;  %v759_v41 = vld [vmem:[#allocation6 + $0x838] sm:$0xff]  ;;  %v2356_v46 = vpack.c.bf16 %v757_v39, %v753_v38  ;;  %v786_v38 = vld [vmem:[#allocation6 + $0x910] sm:$0xff] }
 0x150   : > { %v2548_v50 = vpack.c.bf16 %v759_v41, %v755_v40  ;;  %v790_v40 = vld [vmem:[#allocation6 + $0x930] sm:$0xff]  ;;  %v793_v41 = vld [vmem:[#allocation6 + $0x948] sm:$0xff] }
 0x151   : > { %2339 = vmatpush1.bf16.msra.mxu0 %v2338_v52  ;;  %v761_v52 = vld [vmem:[#allocation6 + $0x848] sm:$0xff]  ;;  %v2566_v48 = vpack.c.bf16 %v790_v40, %v786_v38  ;;  %v824_v38 = vld [vmem:[#allocation6 + $0xa40] sm:$0xff]  ;;  %v826_v40 = vld [vmem:[#allocation6 + $0xa50] sm:$0xff] }
 0x152   : > { %2531 = vmatpush1.bf16.msra.mxu1 %v2530_v53  ;;  %2341 = vmatprep.subr.bf16.mxu0 %v2340_v54  ;;  %v765_v53 = vld [vmem:[#allocation6 + $0x868] sm:$0xff]  ;;  %v893_v54 = vrot.slane %v3589_v31, %v892_v42  ;;  %v2362_v31 = vpack.c.bf16 %v764_v61, %v760_v60  ;;  %v2380_v61 = vpack.c.bf16 %v805_v56, %v801_v55  ;;  %v838_v56 = vld [vmem:[#allocation6 + $0xab0] sm:$0xff] }
 0x153   : > { %2533 = vmatprep.subr.bf16.mxu1 %v2532_v58  ;;  %v2550_v58 = vpack.c.bf16 %v758_v51, %v754_v49  ;;  %v2360_v59 = vpack.c.bf16 %v765_v53, %v761_v52  ;;  %v796_v51 = vld [vmem:[#allocation6 + $0x960] sm:$0xff]  ;;  %v794_v52 = vld [vmem:[#allocation6 + $0x950] sm:$0xff] }
 0x155   : > { %2343 = vmatpush1.bf16.msra.mxu0 %v2342_v0  ;;  %v766_v0 = vld [vmem:[#allocation6 + $0x870] sm:$0xff] }
 0x156   : > { %2535 = vmatpush1.bf16.msra.mxu1 %v2534_v1  ;;  %2345 = vmatprep.subr.bf16.mxu0 %v2344_v2  ;;  %v769_v1 = vld [vmem:[#allocation6 + $0x888] sm:$0xff]  ;;  %v2554_v5 = vpack.c.bf16 %v766_v0, %v762_v62  ;;  %v800_v62 = vld [vmem:[#allocation6 + $0x980] sm:$0xff]  ;;  %v802_v0 = vld [vmem:[#allocation6 + $0x990] sm:$0xff] }
 0x157   : > { %2537 = vmatprep.subr.bf16.mxu1 %v2536_v6  ;;  %v773_v2 = vld [vmem:[#allocation6 + $0x8a8] sm:$0xff] }
 0x158   : > { %v2364_v6 = vpack.c.bf16 %v773_v2, %v769_v1  ;;  %v806_v2 = vld [vmem:[#allocation6 + $0x9b0] sm:$0xff] }
 0x159   : > { %2347 = vmatpush1.bf16.msra.mxu0 %v2346_v14  ;;  %v777_v14 = vld [vmem:[#allocation6 + $0x8c8] sm:$0xff]  ;;  %v2574_v8 = vpack.c.bf16 %v806_v2, %v802_v0  ;;  %v840_v0 = vld [vmem:[#allocation6 + $0xac0] sm:$0xff]  ;;  %v842_v2 = vld [vmem:[#allocation6 + $0xad0] sm:$0xff] }
 0x15a   : > { %2539 = vmatpush1.bf16.msra.mxu1 %v2538_v15  ;;  %2349 = vmatprep.subr.bf16.mxu0 %v2348_v16  ;;  %v781_v15 = vld [vmem:[#allocation6 + $0x8e8] sm:$0xff]  ;;  %v779_v16 = vld [vmem:[#allocation6 + $0x8d8] sm:$0xff] }
 0x15b   : > { %2541 = vmatprep.subr.bf16.mxu1 %v2540_v20  ;;  %v2368_v20 = vpack.c.bf16 %v781_v15, %v777_v14  ;;  %v2560_v26 = vpack.c.bf16 %v783_v17, %v779_v16  ;;  %v814_v15 = vld [vmem:[#allocation6 + $0x9f0] sm:$0xff]  ;;  %v817_v16 = vld [vmem:[#allocation6 + $0xa08] sm:$0xff] }
 0x15c   : > { %v821_v17 = vld [vmem:[#allocation6 + $0xa28] sm:$0xff]  ;;  %v2578_v21 = vpack.c.bf16 %v814_v15, %v810_v13  ;;  %v848_v13 = vld [vmem:[#allocation6 + $0xb00] sm:$0xff]  ;;  %v850_v15 = vld [vmem:[#allocation6 + $0xb10] sm:$0xff] }
 0x15d   : > { %2351 = vmatpush1.bf16.msra.mxu0 %v2350_v28  ;;  %v785_v28 = vld [vmem:[#allocation6 + $0x908] sm:$0xff]  ;;  %v2388_v22 = vpack.c.bf16 %v821_v17, %v817_v16  ;;  %v854_v17 = vld [vmem:[#allocation6 + $0xb30] sm:$0xff] }
 0x15e   : > { %2543 = vmatpush1.bf16.msra.mxu1 %v2542_v29  ;;  %2353 = vmatprep.subr.bf16.mxu0 %v2352_v30  ;;  %v789_v29 = vld [vmem:[#allocation6 + $0x928] sm:$0xff]  ;;  %v787_v30 = vld [vmem:[#allocation6 + $0x918] sm:$0xff] }
 0x15f   : > { %2545 = vmatprep.subr.bf16.mxu1 %v2544_v35  ;;  %v2372_v34 = vpack.c.bf16 %v789_v29, %v785_v28  ;;  %v784_v35 = vld [vmem:[#allocation6 + $0x900] sm:$0xff]  ;;  %v2564_v39 = vpack.c.bf16 %v791_v32, %v787_v30  ;;  %v822_v29 = vld [vmem:[#allocation6 + $0xa30] sm:$0xff]  ;;  %v825_v30 = vld [vmem:[#allocation6 + $0xa48] sm:$0xff] }
 0x160   : > { %v2374_v47 = vpack.c.bf16 %v788_v36, %v784_v35  ;;  %v829_v32 = vld [vmem:[#allocation6 + $0xa68] sm:$0xff] }
 0x161   : > { %2355 = vmatpush1.bf16.msra.mxu0 %v2354_v44  ;;  %v797_v44 = vld [vmem:[#allocation6 + $0x968] sm:$0xff]  ;;  %v2392_v36 = vpack.c.bf16 %v829_v32, %v825_v30  ;;  %v862_v32 = vld [vmem:[#allocation6 + $0xb70] sm:$0xff] }
 0x162   : > { %2547 = vmatpush1.bf16.msra.mxu1 %v2546_v45  ;;  %2357 = vmatprep.subr.bf16.mxu0 %v2356_v46  ;;  %v795_v45 = vld [vmem:[#allocation6 + $0x958] sm:$0xff]  ;;  %v2376_v49 = vpack.c.bf16 %v797_v44, %v793_v41  ;;  %v830_v44 = vld [vmem:[#allocation6 + $0xa70] sm:$0xff] }
 0x163   : > { %2549 = vmatprep.subr.bf16.mxu1 %v2548_v50  ;;  %v799_v46 = vld [vmem:[#allocation6 + $0x978] sm:$0xff]  ;;  %v792_v50 = vld [vmem:[#allocation6 + $0x940] sm:$0xff] }
 0x164   : > { %1069 = vmatmul.mubr.f32.vlgmr.msra.gmra.mrb[0].mxu0 %v893_v54  ;;  %v2568_v53 = vpack.c.bf16 %v799_v46, %v795_v45  ;;  %v833_v45 = vld [vmem:[#allocation6 + $0xa88] sm:$0xff] }
 0x165   : > { %2359 = vmatpush1.bf16.msra.mxu0 %v2358_v57  ;;  %1282 = vmatmul.mubr.f32.vlgmr.msra.gmra.mrb[0].mxu1 %v893_v54  ;;  %v798_v54 = vld [vmem:[#allocation6 + $0x970] sm:$0xff]  ;;  %v803_v57 = vld [vmem:[#allocation6 + $0x998] sm:$0xff]  ;;  %v837_v46 = vld [vmem:[#allocation6 + $0xaa8] sm:$0xff] }
 0x166   : > { %2551 = vmatpush1.bf16.msra.mxu1 %v2550_v58  ;;  %2361 = vmatprep.subr.bf16.mxu0 %v2360_v59  ;;  %v807_v58 = vld [vmem:[#allocation6 + $0x9b8] sm:$0xff]  ;;  %v2378_v59 = vpack.c.bf16 %v796_v51, %v792_v50  ;;  %v2570_v60 = vpack.c.bf16 %v798_v54, %v794_v52  ;;  %v2586_v50 = vpack.c.bf16 %v830_v44, %v826_v40  ;;  %v832_v52 = vld [vmem:[#allocation6 + $0xa80] sm:$0xff]  ;;  %v834_v54 = vld [vmem:[#allocation6 + $0xa90] sm:$0xff] }
 0x167   : > { %2553 = vmatprep.subr.bf16.mxu1 %v2552_v63  ;;  %1139 = vmatprep.mubr.f32.mxu0 %v3602_v37  ;;  %v804_v63 = vld [vmem:[#allocation6 + $0x9a0] sm:$0xff]  ;;  %v2572_v1 = vpack.c.bf16 %v807_v58, %v803_v57  ;;  %v2396_v51 = vpack.c.bf16 %v837_v46, %v833_v45  ;;  %v841_v57 = vld [vmem:[#allocation6 + $0xac8] sm:$0xff]  ;;  %v866_v44 = vld [vmem:[#allocation6 + $0xb90] sm:$0xff] }
 0x168   : > { %1352 = vmatprep.mubr.f32.mxu1 %v3602_v37  ;;  %v2562_v37 = vpack.c.bf16 %v782_v27, %v778_v25  ;;  %v816_v25 = vld [vmem:[#allocation6 + $0xa00] sm:$0xff]  ;;  %v818_v27 = vld [vmem:[#allocation6 + $0xa10] sm:$0xff]  ;;  %v845_v58 = vld [vmem:[#allocation6 + $0xae8] sm:$0xff] }
 0x169   : > { %2363 = vmatpush1.bf16.msra.mxu0 %v2362_v31  ;;  %v811_v31 = vld [vmem:[#allocation6 + $0x9d8] sm:$0xff]  ;;  %v2582_v35 = vpack.c.bf16 %v822_v29, %v818_v27  ;;  %v856_v27 = vld [vmem:[#allocation6 + $0xb40] sm:$0xff]  ;;  %v858_v29 = vld [vmem:[#allocation6 + $0xb50] sm:$0xff] }
 0x16a   : > { %2555 = vmatpush1.bf16.msra.mxu1 %v2554_v5  ;;  %2365 = vmatprep.subr.bf16.mxu0 %v2364_v6  ;;  %v815_v5 = vld [vmem:[#allocation6 + $0x9f8] sm:$0xff]  ;;  %v2382_v6 = vpack.c.bf16 %v804_v63, %v800_v62  ;;  %v2590_v62 = vpack.c.bf16 %v838_v56, %v834_v54  ;;  %v2400_v63 = vpack.c.bf16 %v845_v58, %v841_v57  ;;  %v864_v40 = vld [vmem:[#allocation6 + $0xb80] sm:$0xff]  ;;  %v870_v46 = vld [vmem:[#allocation6 + $0xbb0] sm:$0xff] }
 0x16b   : > { %2557 = vmatprep.subr.bf16.mxu1 %v2556_v11  ;;  %v812_v11 = vld [vmem:[#allocation6 + $0x9e0] sm:$0xff]  ;;  %v2576_v14 = vpack.c.bf16 %v815_v5, %v811_v31  ;;  %v849_v31 = vld [vmem:[#allocation6 + $0xb08] sm:$0xff]  ;;  %v874_v56 = vld [vmem:[#allocation6 + $0xbd0] sm:$0xff] }
 0x16c   : > { %v853_v5 = vld [vmem:[#allocation6 + $0xb28] sm:$0xff]  ;;  %v872_v54 = vld [vmem:[#allocation6 + $0xbc0] sm:$0xff]  ;;  %v878_v58 = vld [vmem:[#allocation6 + $0xbf0] sm:$0xff] }
 0x16d   : > { %2367 = vmatpush1.bf16.msra.mxu0 %v2366_v18  ;;  %v819_v18 = vld [vmem:[#allocation6 + $0xa18] sm:$0xff] }
 0x16e   : > { %2559 = vmatpush1.bf16.msra.mxu1 %v2558_v19  ;;  %2369 = vmatprep.subr.bf16.mxu0 %v2368_v20  ;;  %v823_v19 = vld [vmem:[#allocation6 + $0xa38] sm:$0xff]  ;;  %v2386_v20 = vpack.c.bf16 %v812_v11, %v808_v10  ;;  %v2594_v10 = vpack.c.bf16 %v846_v4, %v842_v2  ;;  %v2404_v11 = vpack.c.bf16 %v853_v5, %v849_v31  ;;  %v1376_v2 = vld [vmem:[#allocation9 + $0x28] sm:$0xff]  ;;  %v1375_v5 = vld [vmem:[#allocation9 + $0x20] sm:$0xff] }
 0x16f   : > { %2561 = vmatprep.subr.bf16.mxu1 %v2560_v26  ;;  %v820_v26 = vld [vmem:[#allocation6 + $0xa20] sm:$0xff]  ;;  %v2580_v28 = vpack.c.bf16 %v823_v19, %v819_v18  ;;  %v857_v18 = vld [vmem:[#allocation6 + $0xb48] sm:$0xff] }
 0x170   : > { %v861_v19 = vld [vmem:[#allocation6 + $0xb68] sm:$0xff] }
 0x171   : > { %2371 = vmatpush1.bf16.msra.mxu0 %v2370_v33  ;;  %v827_v33 = vld [vmem:[#allocation6 + $0xa58] sm:$0xff] }
 0x172   : > { %2563 = vmatpush1.bf16.msra.mxu1 %v2562_v37  ;;  %2373 = vmatprep.subr.bf16.mxu0 %v2372_v34  ;;  %v831_v37 = vld [vmem:[#allocation6 + $0xa78] sm:$0xff]  ;;  %v2390_v34 = vpack.c.bf16 %v820_v26, %v816_v25  ;;  %v2598_v25 = vpack.c.bf16 %v854_v17, %v850_v15  ;;  %v2408_v26 = vpack.c.bf16 %v861_v19, %v857_v18  ;;  %v1384_v15 = vld [vmem:[#allocation9 + $0x68] sm:$0xff]  ;;  %v1383_v19 = vld [vmem:[#allocation9 + $0x60] sm:$0xff] }
 0x173   : > { %2565 = vmatprep.subr.bf16.mxu1 %v2564_v39  ;;  %v828_v39 = vld [vmem:[#allocation6 + $0xa60] sm:$0xff]  ;;  %v2584_v41 = vpack.c.bf16 %v831_v37, %v827_v33  ;;  %v865_v33 = vld [vmem:[#allocation6 + $0xb88] sm:$0xff] }
 0x174   : > { %v869_v37 = vld [vmem:[#allocation6 + $0xba8] sm:$0xff] }
 0x175   : > { %2375 = vmatpush1.bf16.msra.mxu0 %v2374_v47  ;;  %v835_v47 = vld [vmem:[#allocation6 + $0xa98] sm:$0xff] }
 0x176   : > { %2567 = vmatpush1.bf16.msra.mxu1 %v2566_v48  ;;  %2377 = vmatprep.subr.bf16.mxu0 %v2376_v49  ;;  %v839_v48 = vld [vmem:[#allocation6 + $0xab8] sm:$0xff]  ;;  %v2394_v49 = vpack.c.bf16 %v828_v39, %v824_v38  ;;  %v2602_v38 = vpack.c.bf16 %v862_v32, %v858_v29  ;;  %v2412_v39 = vpack.c.bf16 %v869_v37, %v865_v33  ;;  %v1391_v33 = vld [vmem:[#allocation9 + $0xa0] sm:$0xff] }
 0x177   : > { %2569 = vmatprep.subr.bf16.mxu1 %v2568_v53  ;;  %v836_v53 = vld [vmem:[#allocation6 + $0xaa0] sm:$0xff]  ;;  %v2588_v55 = vpack.c.bf16 %v839_v48, %v835_v47  ;;  %v873_v47 = vld [vmem:[#allocation6 + $0xbc8] sm:$0xff]  ;;  %v1393_v37 = vld [vmem:[#allocation9 + $0xb0] sm:$0xff] }
 0x178   : > { %v877_v48 = vld [vmem:[#allocation6 + $0xbe8] sm:$0xff]  ;;  %v1394_v29 = vld [vmem:[#allocation9 + $0xb8] sm:$0xff] }
 0x179   : > { %2379 = vmatpush1.bf16.msra.mxu0 %v2378_v59  ;;  %v843_v59 = vld [vmem:[#allocation6 + $0xad8] sm:$0xff] }
 0x17a   : > { %2571 = vmatpush1.bf16.msra.mxu1 %v2570_v60  ;;  %2381 = vmatprep.subr.bf16.mxu0 %v2380_v61  ;;  %v847_v60 = vld [vmem:[#allocation6 + $0xaf8] sm:$0xff]  ;;  %v2398_v61 = vpack.c.bf16 %v836_v53, %v832_v52  ;;  %v2606_v52 = vpack.c.bf16 %v870_v46, %v866_v44  ;;  %v2416_v53 = vpack.c.bf16 %v877_v48, %v873_v47  ;;  %v1399_v47 = vld [vmem:[#allocation9 + $0xe0] sm:$0xff] }
 0x17b   : > { %2573 = vmatprep.subr.bf16.mxu1 %v2572_v1  ;;  %v844_v1 = vld [vmem:[#allocation6 + $0xae0] sm:$0xff]  ;;  %v2592_v3 = vpack.c.bf16 %v847_v60, %v843_v59  ;;  %v1372_v59 = vld [vmem:[#allocation9 + $0x8] sm:$0xff]  ;;  %v1401_v48 = vld [vmem:[#allocation9 + $0xf0] sm:$0xff] }
 0x17c   : > { %v1374_v60 = vld [vmem:[#allocation9 + $0x18] sm:$0xff] }
 0x17d   : > { %2383 = vmatpush1.bf16.msra.mxu0 %v2382_v6  ;;  %v851_v6 = vld [vmem:[#allocation6 + $0xb18] sm:$0xff] }
 0x17e   : > { %2575 = vmatpush1.bf16.msra.mxu1 %v2574_v8  ;;  %2385 = vmatprep.subr.bf16.mxu0 %v2384_v9  ;;  %v855_v8 = vld [vmem:[#allocation6 + $0xb38] sm:$0xff]  ;;  %v2402_v9 = vpack.c.bf16 %v844_v1, %v840_v0  ;;  %v1371_v0 = vld [vmem:[#allocation9] sm:$0xff] }
 0x17f   : > { %2577 = vmatprep.subr.bf16.mxu1 %v2576_v14  ;;  %v852_v14 = vld [vmem:[#allocation6 + $0xb20] sm:$0xff]  ;;  %v2596_v16 = vpack.c.bf16 %v855_v8, %v851_v6  ;;  %v1373_v1 = vld [vmem:[#allocation9 + $0x10] sm:$0xff]  ;;  %v1380_v8 = vld [vmem:[#allocation9 + $0x48] sm:$0xff] }
 0x180   : > { %v2614_v4 = vpack.c.bf16 %v1373_v1, %v1371_v0  ;;  %v1377_v6 = vld [vmem:[#allocation9 + $0x30] sm:$0xff]  ;;  %v1402_v44 = vld [vmem:[#allocation9 + $0xf8] sm:$0xff]  ;;  %v1411_v1 = vld [vmem:[#allocation9 + $0x140] sm:$0xff] }
 0x181   : > { %2387 = vmatpush1.bf16.msra.mxu0 %v2386_v20  ;;  %v859_v20 = vld [vmem:[#allocation6 + $0xb58] sm:$0xff] }
 0x182   : > { %2579 = vmatpush1.bf16.msra.mxu1 %v2578_v21  ;;  %2389 = vmatprep.subr.bf16.mxu0 %v2388_v22  ;;  %v863_v21 = vld [vmem:[#allocation6 + $0xb78] sm:$0xff]  ;;  %v2406_v22 = vpack.c.bf16 %v852_v14, %v848_v13  ;;  %v1379_v13 = vld [vmem:[#allocation9 + $0x40] sm:$0xff] }
 0x183   : > { %2581 = vmatprep.subr.bf16.mxu1 %v2580_v28  ;;  %v860_v28 = vld [vmem:[#allocation6 + $0xb60] sm:$0xff]  ;;  %v2600_v30 = vpack.c.bf16 %v863_v21, %v859_v20  ;;  %v1381_v14 = vld [vmem:[#allocation9 + $0x50] sm:$0xff]  ;;  %v1388_v21 = vld [vmem:[#allocation9 + $0x88] sm:$0xff] }
 0x184   : > { %v2622_v17 = vpack.c.bf16 %v1381_v14, %v1379_v13  ;;  %v1385_v20 = vld [vmem:[#allocation9 + $0x70] sm:$0xff]  ;;  %v1419_v14 = vld [vmem:[#allocation9 + $0x180] sm:$0xff] }
 0x185   : > { %2391 = vmatpush1.bf16.msra.mxu0 %v2390_v34  ;;  %v867_v34 = vld [vmem:[#allocation6 + $0xb98] sm:$0xff] }
 0x186   : > { %2583 = vmatpush1.bf16.msra.mxu1 %v2582_v35  ;;  %2393 = vmatprep.subr.bf16.mxu0 %v2392_v36  ;;  %v871_v35 = vld [vmem:[#allocation6 + $0xbb8] sm:$0xff]  ;;  %v2410_v36 = vpack.c.bf16 %v860_v28, %v856_v27  ;;  %v1392_v28 = vld [vmem:[#allocation9 + $0xa8] sm:$0xff] }
 0x187   : > { %2585 = vmatprep.subr.bf16.mxu1 %v2584_v41  ;;  %v868_v41 = vld [vmem:[#allocation6 + $0xba0] sm:$0xff]  ;;  %v2604_v45 = vpack.c.bf16 %v871_v35, %v867_v34  ;;  %v1389_v27 = vld [vmem:[#allocation9 + $0x90] sm:$0xff]  ;;  %v2632_v32 = vpack.c.bf16 %v1394_v29, %v1392_v28  ;;  %v1396_v34 = vld [vmem:[#allocation9 + $0xc8] sm:$0xff] }
 0x188   : > { %v1398_v35 = vld [vmem:[#allocation9 + $0xd8] sm:$0xff]  ;;  %v1429_v28 = vld [vmem:[#allocation9 + $0x1d0] sm:$0xff] }
 0x189   : > { %2395 = vmatpush1.bf16.msra.mxu0 %v2394_v49  ;;  %v875_v49 = vld [vmem:[#allocation6 + $0xbd8] sm:$0xff] }
 0x18a   : > { %2587 = vmatpush1.bf16.msra.mxu1 %v2586_v50  ;;  %2397 = vmatprep.subr.bf16.mxu0 %v2396_v51  ;;  %v879_v50 = vld [vmem:[#allocation6 + $0xbf8] sm:$0xff]  ;;  %v2414_v51 = vpack.c.bf16 %v868_v41, %v864_v40  ;;  %v1400_v41 = vld [vmem:[#allocation9 + $0xe8] sm:$0xff] }
 0x18b   : > { %2589 = vmatprep.subr.bf16.mxu1 %v2588_v55  ;;  %v876_v55 = vld [vmem:[#allocation6 + $0xbe0] sm:$0xff]  ;;  %v2608_v57 = vpack.c.bf16 %v879_v50, %v875_v49  ;;  %v1397_v40 = vld [vmem:[#allocation9 + $0xd0] sm:$0xff]  ;;  %v2640_v46 = vpack.c.bf16 %v1402_v44, %v1400_v41  ;;  %v1404_v49 = vld [vmem:[#allocation9 + $0x108] sm:$0xff] }
 0x18c   : > { %v1406_v50 = vld [vmem:[#allocation9 + $0x118] sm:$0xff]  ;;  %v1676_v41 = vld [vmem:[#allocation12 + $0x88] sm:$0xff]  ;;  %v1659_v44 = vld [vmem:[#allocation12] sm:$0xff] }
 0x18d   : > { %2399 = vmatpush1.bf16.msra.mxu0 %v2398_v61  ;;  %v2418_v61 = vpack.c.bf16 %v876_v55, %v872_v54  ;;  %v1405_v54 = vld [vmem:[#allocation9 + $0x110] sm:$0xff]  ;;  %v1408_v55 = vld [vmem:[#allocation9 + $0x128] sm:$0xff] }
 0x18e   : > { %2591 = vmatpush1.bf16.msra.mxu1 %v2590_v62  ;;  %2401 = vmatprep.subr.bf16.mxu0 %v2400_v63  ;;  %v2610_v62 = vpack.c.bf16 %v878_v58, %v874_v56  ;;  %v2612_v63 = vpack.c.bf16 %v1374_v60, %v1372_v59  ;;  %v1410_v56 = vld [vmem:[#allocation9 + $0x138] sm:$0xff]  ;;  %v1407_v59 = vld [vmem:[#allocation9 + $0x120] sm:$0xff]  ;;  %v1409_v60 = vld [vmem:[#allocation9 + $0x130] sm:$0xff] }
 0x18f   : > { %2593 = vmatprep.subr.bf16.mxu1 %v2592_v3  ;;  %v1378_v3 = vld [vmem:[#allocation9 + $0x38] sm:$0xff]  ;;  %v2648_v58 = vpack.c.bf16 %v1410_v56, %v1408_v55 }
 0x190   : > { %v2616_v31 = vpack.c.bf16 %v1378_v3, %v1376_v2  ;;  %v1413_v2 = vld [vmem:[#allocation9 + $0x150] sm:$0xff]  ;;  %v1416_v3 = vld [vmem:[#allocation9 + $0x168] sm:$0xff] }
 0x191   : > { %2403 = vmatpush1.bf16.msra.mxu0 %v2402_v9  ;;  %v1382_v9 = vld [vmem:[#allocation9 + $0x58] sm:$0xff] }
 0x192   : > { %2595 = vmatpush1.bf16.msra.mxu1 %v2594_v10  ;;  %2405 = vmatprep.subr.bf16.mxu0 %v2404_v11  ;;  %v2618_v10 = vpack.c.bf16 %v1377_v6, %v1375_v5  ;;  %v2620_v11 = vpack.c.bf16 %v1382_v9, %v1380_v8  ;;  %v1415_v6 = vld [vmem:[#allocation9 + $0x160] sm:$0xff]  ;;  %v1417_v8 = vld [vmem:[#allocation9 + $0x170] sm:$0xff]  ;;  %v1420_v9 = vld [vmem:[#allocation9 + $0x188] sm:$0xff] }
 0x193   : > { %2597 = vmatprep.subr.bf16.mxu1 %v2596_v16  ;;  %v1386_v16 = vld [vmem:[#allocation9 + $0x78] sm:$0xff] }
 0x194   : > { %v2624_v18 = vpack.c.bf16 %v1386_v16, %v1384_v15  ;;  %v1421_v15 = vld [vmem:[#allocation9 + $0x190] sm:$0xff]  ;;  %v1424_v16 = vld [vmem:[#allocation9 + $0x1a8] sm:$0xff] }
 0x195   : > { %2407 = vmatpush1.bf16.msra.mxu0 %v2406_v22  ;;  %v1390_v22 = vld [vmem:[#allocation9 + $0x98] sm:$0xff] }
 0x196   : > { %2599 = vmatpush1.bf16.msra.mxu1 %v2598_v25  ;;  %2409 = vmatprep.subr.bf16.mxu0 %v2408_v26  ;;  %v2626_v25 = vpack.c.bf16 %v1385_v20, %v1383_v19  ;;  %v1387_v26 = vld [vmem:[#allocation9 + $0x80] sm:$0xff] }
 0x197   : > { %2601 = vmatprep.subr.bf16.mxu1 %v2600_v30  ;;  %v2630_v30 = vpack.c.bf16 %v1389_v27, %v1387_v26  ;;  %v1423_v20 = vld [vmem:[#allocation9 + $0x1a0] sm:$0xff] }
 0x198   : > { %v1427_v27 = vld [vmem:[#allocation9 + $0x1c0] sm:$0xff] }
 0x199   : > { %2411 = vmatpush1.bf16.msra.mxu0 %v2410_v36  ;;  %v2634_v36 = vpack.c.bf16 %v1393_v37, %v1391_v33  ;;  %v2670_v29 = vpack.c.bf16 %v1429_v28, %v1427_v27  ;;  %v1431_v37 = vld [vmem:[#allocation9 + $0x1e0] sm:$0xff]  ;;  %v1437_v27 = vld [vmem:[#allocation9 + $0x210] sm:$0xff] }
 0x19a   : > { %2603 = vmatpush1.bf16.msra.mxu1 %v2602_v38  ;;  %2413 = vmatprep.subr.bf16.mxu0 %v2412_v39  ;;  %v2636_v38 = vpack.c.bf16 %v1398_v35, %v1396_v34  ;;  %v1395_v39 = vld [vmem:[#allocation9 + $0xc0] sm:$0xff]  ;;  %v1433_v34 = vld [vmem:[#allocation9 + $0x1f0] sm:$0xff] }
 0x19b   : > { %2605 = vmatprep.subr.bf16.mxu1 %v2604_v45  ;;  %v2638_v45 = vpack.c.bf16 %v1397_v40, %v1395_v39  ;;  %v2674_v35 = vpack.c.bf16 %v1433_v34, %v1431_v37  ;;  %v1675_v40 = vld [vmem:[#allocation12 + $0x80] sm:$0xff] }
 0x19d   : > { %2415 = vmatpush1.bf16.msra.mxu0 %v2414_v51  ;;  %v2642_v51 = vpack.c.bf16 %v1401_v48, %v1399_v47  ;;  %v1677_v47 = vld [vmem:[#allocation12 + $0x90] sm:$0xff]  ;;  %v1678_v48 = vld [vmem:[#allocation12 + $0x98] sm:$0xff] }
 0x19e   : > { %2607 = vmatpush1.bf16.msra.mxu1 %v2606_v52  ;;  %2417 = vmatprep.subr.bf16.mxu0 %v2416_v53  ;;  %v2644_v52 = vpack.c.bf16 %v1406_v50, %v1404_v49  ;;  %v1403_v53 = vld [vmem:[#allocation9 + $0x100] sm:$0xff]  ;;  %v2744_v50 = vpack.c.bf16 %v1678_v48, %v1677_v47  ;;  %v1445_v48 = vld [vmem:[#allocation9 + $0x250] sm:$0xff] }
 0x19f   : > { %2609 = vmatprep.subr.bf16.mxu1 %v2608_v57  ;;  %v2646_v57 = vpack.c.bf16 %v1405_v54, %v1403_v53  ;;  %v1679_v53 = vld [vmem:[#allocation12 + $0xa0] sm:$0xff]  ;;  %v1680_v54 = vld [vmem:[#allocation12 + $0xa8] sm:$0xff] }
 0x1a0   : > { %v2748_v56 = vpack.c.bf16 %v1680_v54, %v1679_v53  ;;  %v1443_v47 = vld [vmem:[#allocation9 + $0x240] sm:$0xff]  ;;  %v1449_v54 = vld [vmem:[#allocation9 + $0x270] sm:$0xff] }
 0x1a1   : > { %2419 = vmatpush1.bf16.msra.mxu0 %v2418_v61  ;;  %v1412_v61 = vld [vmem:[#allocation9 + $0x148] sm:$0xff]  ;;  %v1447_v53 = vld [vmem:[#allocation9 + $0x260] sm:$0xff] }
 0x1a2   : > { %2611 = vmatpush1.bf16.msra.mxu1 %v2610_v62  ;;  %2613 = vmatprep.subr.bf16.mxu0 %v2612_v63  ;;  %v1414_v62 = vld [vmem:[#allocation9 + $0x158] sm:$0xff]  ;;  %v2650_v63 = vpack.c.bf16 %v1409_v60, %v1407_v59 }
 0x1a3   : > { %v2652_v0 = vpack.c.bf16 %v1414_v62, %v1412_v61  ;;  %v1681_v59 = vld [vmem:[#allocation12 + $0xb0] sm:$0xff]  ;;  %v1682_v60 = vld [vmem:[#allocation12 + $0xb8] sm:$0xff] }
 0x1a4   : > { %1140 = vmatmul.mubr.f32.vlgmr.msra.gmra.mrb[0].mxu0 %v3608_v43  ;;  %v2752_v62 = vpack.c.bf16 %v1682_v60, %v1681_v59  ;;  %v1451_v59 = vld [vmem:[#allocation9 + $0x280] sm:$0xff]  ;;  %v1453_v60 = vld [vmem:[#allocation9 + $0x290] sm:$0xff] }
 0x1a5   : > { %1353 = vmatmul.mubr.f32.vlgmr.msra.gmra.mrb[0].mxu1 %v3608_v43  ;;  %2615 = vmatpush1.bf16.msra.mxu0 %v2614_v4  ;;  %v2628_v43 = vpack.c.bf16 %v1390_v22, %v1388_v21  ;;  %v1418_v4 = vld [vmem:[#allocation9 + $0x178] sm:$0xff]  ;;  %v1425_v21 = vld [vmem:[#allocation9 + $0x1b0] sm:$0xff]  ;;  %v1428_v22 = vld [vmem:[#allocation9 + $0x1c8] sm:$0xff] }
 0x1a6   : > { %2617 = vmatprep.subr.bf16.mxu0 %v2616_v31  ;;  %v2654_v31 = vpack.c.bf16 %v1413_v2, %v1411_v1  ;;  %v2656_v5 = vpack.c.bf16 %v1418_v4, %v1416_v3  ;;  %v1683_v1 = vld [vmem:[#allocation12 + $0xc0] sm:$0xff]  ;;  %v1684_v2 = vld [vmem:[#allocation12 + $0xc8] sm:$0xff] }
 0x1a7   : > { %v2756_v4 = vpack.c.bf16 %v1684_v2, %v1683_v1  ;;  %v1455_v1 = vld [vmem:[#allocation9 + $0x2a0] sm:$0xff]  ;;  %v1457_v2 = vld [vmem:[#allocation9 + $0x2b0] sm:$0xff] }
 0x1a9   : > { %2619 = vmatpush1.bf16.msra.mxu0 %v2618_v10  ;;  %v1422_v10 = vld [vmem:[#allocation9 + $0x198] sm:$0xff] }
 0x1aa   : > { %2621 = vmatprep.subr.bf16.mxu0 %v2620_v11  ;;  %v2658_v11 = vpack.c.bf16 %v1417_v8, %v1415_v6  ;;  %v2660_v13 = vpack.c.bf16 %v1422_v10, %v1420_v9  ;;  %v1685_v6 = vld [vmem:[#allocation12 + $0xd0] sm:$0xff]  ;;  %v1686_v8 = vld [vmem:[#allocation12 + $0xd8] sm:$0xff] }
 0x1ab   : > { %v2760_v10 = vpack.c.bf16 %v1686_v8, %v1685_v6  ;;  %v1459_v6 = vld [vmem:[#allocation9 + $0x2c0] sm:$0xff]  ;;  %v1461_v8 = vld [vmem:[#allocation9 + $0x2d0] sm:$0xff] }
 0x1ad   : > { %2623 = vmatpush1.bf16.msra.mxu0 %v2622_v17  ;;  %v1426_v17 = vld [vmem:[#allocation9 + $0x1b8] sm:$0xff] }
 0x1ae   : > { %2625 = vmatprep.subr.bf16.mxu0 %v2624_v18  ;;  %v2662_v18 = vpack.c.bf16 %v1421_v15, %v1419_v14  ;;  %v2664_v19 = vpack.c.bf16 %v1426_v17, %v1424_v16  ;;  %v3618_v15 = vld [vmem:[#allocation7] sm:$0xf] }
 0x1af   : > { %v916_v16 = vrot.slane %v3618_v15, %v3594_v12  ;;  %v920_v17 = vrot.slane %v3618_v15, %v3587_v24 }
 0x1b1   : > { %2627 = vmatpush1.bf16.msra.mxu0 %v2626_v25  ;;  %v1430_v25 = vld [vmem:[#allocation9 + $0x1d8] sm:$0xff] }
 0x1b2   : > { %2629 = vmatprep.subr.bf16.mxu0 %v2628_v43  ;;  %v2666_v43 = vpack.c.bf16 %v1425_v21, %v1423_v20  ;;  %v2668_v26 = vpack.c.bf16 %v1430_v25, %v1428_v22 }
 0x1b5   : > { %2631 = vmatpush1.bf16.msra.mxu0 %v2630_v30  ;;  %v1432_v30 = vld [vmem:[#allocation9 + $0x1e8] sm:$0xff] }
 0x1b6   : > { %2633 = vmatprep.subr.bf16.mxu0 %v2632_v32  ;;  %v1434_v32 = vld [vmem:[#allocation9 + $0x1f8] sm:$0xff] }
 0x1b7   : > { %v2672_v33 = vpack.c.bf16 %v1434_v32, %v1432_v30  ;;  %v1440_v30 = vld [vmem:[#allocation9 + $0x228] sm:$0xff]  ;;  %v1442_v32 = vld [vmem:[#allocation9 + $0x238] sm:$0xff] }
 0x1b9   : > { %2635 = vmatpush1.bf16.msra.mxu0 %v2634_v36  ;;  %v1436_v36 = vld [vmem:[#allocation9 + $0x208] sm:$0xff] }
 0x1ba   : > { %2637 = vmatprep.subr.bf16.mxu0 %v2636_v38  ;;  %v1438_v38 = vld [vmem:[#allocation9 + $0x218] sm:$0xff] }
 0x1bb   : > { %v2676_v39 = vpack.c.bf16 %v1438_v38, %v1436_v36  ;;  %v1439_v36 = vld [vmem:[#allocation9 + $0x220] sm:$0xff]  ;;  %v1441_v38 = vld [vmem:[#allocation9 + $0x230] sm:$0xff] }
 0x1bd   : > { %2639 = vmatpush1.bf16.msra.mxu0 %v2638_v45  ;;  %v2740_v45 = vpack.c.bf16 %v1676_v41, %v1675_v40  ;;  %v1444_v40 = vld [vmem:[#allocation9 + $0x248] sm:$0xff]  ;;  %v1446_v41 = vld [vmem:[#allocation9 + $0x258] sm:$0xff] }
 0x1be   : > { %2641 = vmatprep.subr.bf16.mxu0 %v2640_v46  ;;  %v1660_v46 = vld [vmem:[#allocation12 + $0x8] sm:$0xff] }
 0x1bf   : > { %v2742_v49 = vpack.c.bf16 %v1660_v46, %v1659_v44  ;;  %2741 = vmatprep.subr.bf16.mxu1 %v2740_v45  ;;  %v2682_v45 = vpack.c.bf16 %v1441_v38, %v1439_v36  ;;  %v2684_v46 = vpack.c.bf16 %v1446_v41, %v1444_v40  ;;  %v1480_v36 = vld [vmem:[#allocation9 + $0x368] sm:$0xff]  ;;  %v1482_v38 = vld [vmem:[#allocation9 + $0x378] sm:$0xff]  ;;  %v1479_v41 = vld [vmem:[#allocation9 + $0x360] sm:$0xff] }
 0x1c0   : > { %v2720_v40 = vpack.c.bf16 %v1482_v38, %v1480_v36  ;;  %v1769_v38 = vld [vmem:[%s3776_s8 + $0x20] sm:$0xff] }
 0x1c1   : > { %2643 = vmatpush1.bf16.msra.mxu0 %v2642_v51  ;;  %v1661_v51 = vld [vmem:[#allocation12 + $0x10] sm:$0xff]  ;;  %2743 = vmatpush3.bf16.msra.mxu1 %v2742_v49  ;;  %v1448_v49 = vld [vmem:[#allocation9 + $0x268] sm:$0xff] }
 0x1c2   : > { %2645 = vmatprep.subr.bf16.mxu0 %v2644_v52  ;;  %v1662_v52 = vld [vmem:[#allocation12 + $0x18] sm:$0xff]  ;;  %2745 = vmatprep.subr.bf16.mxu1 %v2744_v50 }
 0x1c3   : > { %v2746_v55 = vpack.c.bf16 %v1662_v52, %v1661_v51  ;;  %v1450_v50 = vld [vmem:[#allocation9 + $0x278] sm:$0xff]  ;;  %v2686_v51 = vpack.c.bf16 %v1445_v48, %v1443_v47 }
 0x1c4   : > { %v2688_v52 = vpack.c.bf16 %v1450_v50, %v1448_v49  ;;  %v1483_v49 = vld [vmem:[#allocation9 + $0x380] sm:$0xff]  ;;  %v1485_v50 = vld [vmem:[#allocation9 + $0x390] sm:$0xff] }
 0x1c5   : > { %2647 = vmatpush1.bf16.msra.mxu0 %v2646_v57  ;;  %v1663_v57 = vld [vmem:[#allocation12 + $0x20] sm:$0xff]  ;;  %2747 = vmatpush3.bf16.msra.mxu1 %v2746_v55 }
 0x1c6   : > { %2649 = vmatprep.subr.bf16.mxu0 %v2648_v58  ;;  %v1664_v58 = vld [vmem:[#allocation12 + $0x28] sm:$0xff]  ;;  %2749 = vmatprep.subr.bf16.mxu1 %v2748_v56  ;;  %v1454_v56 = vld [vmem:[#allocation9 + $0x298] sm:$0xff] }
 0x1c7   : > { %v2750_v61 = vpack.c.bf16 %v1664_v58, %v1663_v57  ;;  %v1452_v55 = vld [vmem:[#allocation9 + $0x288] sm:$0xff]  ;;  %v2690_v57 = vpack.c.bf16 %v1449_v54, %v1447_v53  ;;  %v2726_v53 = vpack.c.bf16 %v1485_v50, %v1483_v49  ;;  %v1776_v50 = vld [vmem:[%s3776_s8 + $0x58] sm:$0xff] }
 0x1c8   : > { %v2692_v58 = vpack.c.bf16 %v1454_v56, %v1452_v55  ;;  %v1487_v55 = vld [vmem:[#allocation9 + $0x3a0] sm:$0xff]  ;;  %v1489_v56 = vld [vmem:[#allocation9 + $0x3b0] sm:$0xff] }
 0x1c9   : > { %2651 = vmatpush1.bf16.msra.mxu0 %v2650_v63  ;;  %v1665_v63 = vld [vmem:[#allocation12 + $0x30] sm:$0xff]  ;;  %2751 = vmatpush3.bf16.msra.mxu1 %v2750_v61  ;;  %v1456_v61 = vld [vmem:[#allocation9 + $0x2a8] sm:$0xff] }
 0x1ca   : > { %2653 = vmatprep.subr.bf16.mxu0 %v2652_v0  ;;  %v1666_v0 = vld [vmem:[#allocation12 + $0x38] sm:$0xff]  ;;  %2753 = vmatprep.subr.bf16.mxu1 %v2752_v62  ;;  %v1775_v49 = vld [vmem:[%s3776_s8 + $0x50] sm:$0xff] }
 0x1cb   : > { %v2754_v3 = vpack.c.bf16 %v1666_v0, %v1665_v63  ;;  %v1458_v62 = vld [vmem:[#allocation9 + $0x2b8] sm:$0xff]  ;;  %v2694_v63 = vpack.c.bf16 %v1453_v60, %v1451_v59  ;;  %v2730_v59 = vpack.c.bf16 %v1489_v56, %v1487_v55  ;;  %v1779_v55 = vld [vmem:[%s3776_s8 + $0x70] sm:$0xff] }
 0x1cc   : > { %v2696_v0 = vpack.c.bf16 %v1458_v62, %v1456_v61  ;;  %v1491_v61 = vld [vmem:[#allocation9 + $0x3c0] sm:$0xff]  ;;  %v1493_v62 = vld [vmem:[#allocation9 + $0x3d0] sm:$0xff] }
 0x1cd   : > { %2655 = vmatpush1.bf16.msra.mxu0 %v2654_v31  ;;  %v1667_v31 = vld [vmem:[#allocation12 + $0x40] sm:$0xff]  ;;  %2755 = vmatpush3.bf16.msra.mxu1 %v2754_v3  ;;  %v1780_v56 = vld [vmem:[%s3776_s8 + $0x78] sm:$0xff] }
 0x1ce   : > { %2657 = vmatprep.subr.bf16.mxu0 %v2656_v5  ;;  %v1668_v5 = vld [vmem:[#allocation12 + $0x48] sm:$0xff]  ;;  %2757 = vmatprep.subr.bf16.mxu1 %v2756_v4  ;;  %v1462_v4 = vld [vmem:[#allocation9 + $0x2d8] sm:$0xff] }
 0x1cf   : > { %v2758_v9 = vpack.c.bf16 %v1668_v5, %v1667_v31  ;;  %v1460_v3 = vld [vmem:[#allocation9 + $0x2c8] sm:$0xff]  ;;  %v2698_v31 = vpack.c.bf16 %v1457_v2, %v1455_v1  ;;  %v1498_v1 = vld [vmem:[#allocation9 + $0x3f8] sm:$0xff]  ;;  %v2734_v2 = vpack.c.bf16 %v1493_v62, %v1491_v61 }
 0x1d0   : > { %v2700_v5 = vpack.c.bf16 %v1462_v4, %v1460_v3  ;;  %v1495_v4 = vld [vmem:[#allocation9 + $0x3e0] sm:$0xff] }
 0x1d1   : > { %2659 = vmatpush1.bf16.msra.mxu0 %v2658_v11  ;;  %v1669_v11 = vld [vmem:[#allocation12 + $0x50] sm:$0xff]  ;;  %2759 = vmatpush3.bf16.msra.mxu1 %v2758_v9  ;;  %v1464_v9 = vld [vmem:[#allocation9 + $0x2e8] sm:$0xff] }
 0x1d2   : > { %2661 = vmatprep.subr.bf16.mxu0 %v2660_v13  ;;  %v1670_v13 = vld [vmem:[#allocation12 + $0x58] sm:$0xff]  ;;  %2761 = vmatprep.subr.bf16.mxu1 %v2760_v10 }
 0x1d3   : > { %v2762_v14 = vpack.c.bf16 %v1670_v13, %v1669_v11  ;;  %v1466_v10 = vld [vmem:[#allocation9 + $0x2f8] sm:$0xff]  ;;  %v2702_v11 = vpack.c.bf16 %v1461_v8, %v1459_v6 }
 0x1d4   : > { %v2704_v13 = vpack.c.bf16 %v1466_v10, %v1464_v9  ;;  %v1671_v10 = vld [vmem:[#allocation12 + $0x60] sm:$0xff] }
 0x1d5   : > { %2663 = vmatpush1.bf16.msra.mxu0 %v2662_v18  ;;  %2763 = vmatpush3.bf16.msra.mxu1 %v2762_v14  ;;  %v928_v18 = vrot.slane %v3618_v15, %v896_v23  ;;  %v1463_v14 = vld [vmem:[#allocation9 + $0x2e0] sm:$0xff] }
 0x1d6   : > { %2665 = vmatprep.subr.bf16.mxu0 %v2664_v19 }
 0x1d9   : > { %2667 = vmatpush1.bf16.msra.mxu0 %v2666_v43 }
 0x1da   : > { %2669 = vmatprep.subr.bf16.mxu0 %v2668_v26  ;;  %v1435_v26 = vld [vmem:[#allocation9 + $0x200] sm:$0xff] }
 0x1db   : > { %v2678_v34 = vpack.c.bf16 %v1437_v27, %v1435_v26  ;;  %v1474_v26 = vld [vmem:[#allocation9 + $0x338] sm:$0xff] }
 0x1dd   : > { %2671 = vmatpush1.bf16.msra.mxu0 %v2670_v29 }
 0x1de   : > { %2673 = vmatprep.subr.bf16.mxu0 %v2672_v33 }
 0x1e1   : > { %2675 = vmatpush1.bf16.msra.mxu0 %v2674_v35  ;;  %v2680_v35 = vpack.c.bf16 %v1442_v32, %v1440_v30  ;;  %v1473_v30 = vld [vmem:[#allocation9 + $0x330] sm:$0xff]  ;;  %v1476_v32 = vld [vmem:[#allocation9 + $0x348] sm:$0xff] }
 0x1e2   : > { %2677 = vmatprep.subr.bf16.mxu0 %v2676_v39 }
 0x277   : > { %v1141_v19 = vpop.f32.mrb[0].mxu0 }
 0x278   : > { %v2808_v20 = vadd.f32 %v1141_v19, %v916_v16  ;;  %v3627_v21 = vpop.f32.mrb[0].mxu1  ;;  %v1143_v22 = vpop.f32.mrb[1].mxu0  ;;  %v1465_v16 = vld [vmem:[#allocation9 + $0x2f0] sm:$0xff] }
 0x279   : > { %v2809_v25 = vadd.f32 %v1143_v22, %v920_v17  ;;  %v1356_v43 = vpop.f32.mrb[1].mxu1  ;;  %v1468_v17 = vld [vmem:[#allocation9 + $0x308] sm:$0xff]  ;;  %v2706_v19 = vpack.c.bf16 %v1465_v16, %v1463_v14  ;;  %v1467_v22 = vld [vmem:[#allocation9 + $0x300] sm:$0xff]  ;;  %v1689_v14 = vld [vmem:[#allocation12 + $0xf0] sm:$0xff] }
 0x27a   : > { %v1363_v28 = vmul.f32 0.01, %v2808_v20  ;;  %v2811_v29 = vadd.f32 %v1356_v43, %v928_v18  ;;  %vm1359_vm0 = vcmp.gt.f32.partialorder %v2808_v20, 0.0  ;;  %v1470_v18 = vld [vmem:[#allocation9 + $0x318] sm:$0xff]  ;;  %v1472_v43 = vld [vmem:[#allocation9 + $0x328] sm:$0xff] }
 0x27b   : > { %v1364_v33 = vmul.f32 0.01, %v2809_v25  ;;  %vm1360_vm1 = vcmp.gt.f32.partialorder %v2809_v25, 0.0  ;;  %v1690_v16 = vld [vmem:[#allocation12 + $0xf8] sm:$0xff] }
 0x27c   : > { %v1366_v37 = vmul.f32 0.01, %v2811_v29  ;;  %vm1362_vm2 = vcmp.gt.f32.partialorder %v2811_v29, 0.0  ;;  %v1367_v39 = vsel %vm1359_vm0, %v2808_v20, %v1363_v28  ;;  %v2708_v20 = vpack.c.bf16 %v1470_v18, %v1468_v17  ;;  %v1674_v18 = vld [vmem:[#allocation12 + $0x78] sm:$0xff] }
 0x27d   : > { %v1368_v23 = vsel %vm1360_vm1, %v2809_v25, %v1364_v33  ;;  %v1469_v25 = vld [vmem:[#allocation9 + $0x310] sm:$0xff]  ;;  %v2712_v28 = vpack.c.bf16 %v1474_v26, %v1472_v43  ;;  %v1478_v33 = vld [vmem:[#allocation9 + $0x358] sm:$0xff]  ;;  %v2768_v17 = vpack.c.bf16 %v1690_v16, %v1689_v14 }
 0x27e   : > { %1575 = vmatprep.mubr.f32.mxu0 %v1368_v23  ;;  %v1370_v44 = vsel %vm1362_vm2, %v2811_v29, %v1366_v37  ;;  %v2710_v27 = vpack.c.bf16 %v1469_v25, %v1467_v22  ;;  %v1471_v29 = vld [vmem:[#allocation9 + $0x320] sm:$0xff] }
 0x27f   : > { %1576 = vmatmul.mubr.f32.vlgmr.msra.gmra.mrb[2].mxu0 %v1367_v39  ;;  %v2714_v37 = vpack.c.bf16 %v1473_v30, %v1471_v29  ;;  %v1475_v23 = vld [vmem:[#allocation9 + $0x340] sm:$0xff] }
 0x280   : > { %2679 = vmatpush1.bf16.msra.mxu0 %v2678_v34  ;;  %1646 = vmatprep.mubr.f32.mxu0 %v1370_v44  ;;  %v2716_v34 = vpack.c.bf16 %v1478_v33, %v1476_v32  ;;  %v1481_v44 = vld [vmem:[#allocation9 + $0x370] sm:$0xff]  ;;  %v1499_v22 = vld [vmem:[#allocation10] sm:$0x3]  ;;  %v1766_v32 = vld [vmem:[%s3776_s8 + $0x8] sm:$0xff] }
 0x281   : > { %2681 = vmatprep.subr.bf16.mxu0 %v2680_v35  ;;  %v1477_v35 = vld [vmem:[#allocation9 + $0x350] sm:$0xff]  ;;  %v2722_v47 = vpack.c.bf16 %v1481_v44, %v1479_v41  ;;  %v1504_v25 = vrot.slane %v1499_v22, %v3594_v12  ;;  %v1508_v43 = vrot.slane %v1499_v22, %v3587_v24  ;;  %v1765_v30 = vld [vmem:[%s3776_s8] sm:$0xff] }
 0x282   : > { %v2718_v39 = vpack.c.bf16 %v1477_v35, %v1475_v23  ;;  %v1767_v24 = vld [vmem:[%s3776_s8 + $0x10] sm:$0xff]  ;;  %v1768_v23 = vld [vmem:[%s3776_s8 + $0x18] sm:$0xff] }
 0x283   : > { %v2776_v36 = vpack.c.bf16 %v1768_v23, %v1767_v24  ;;  %v1771_v41 = vld [vmem:[%s3776_s8 + $0x30] sm:$0xff]  ;;  %v1772_v44 = vld [vmem:[%s3776_s8 + $0x38] sm:$0xff] }
 0x284   : > { %2683 = vmatpush1.bf16.msra.mxu0 %v2682_v45  ;;  %v1484_v45 = vld [vmem:[#allocation9 + $0x388] sm:$0xff] }
 0x285   : > { %2685 = vmatprep.subr.bf16.mxu0 %v2684_v46  ;;  %v1486_v46 = vld [vmem:[#allocation9 + $0x398] sm:$0xff] }
 0x286   : > { %v2724_v48 = vpack.c.bf16 %v1486_v46, %v1484_v45  ;;  %v2782_v45 = vpack.c.bf16 %v1772_v44, %v1771_v41  ;;  %v1773_v46 = vld [vmem:[%s3776_s8 + $0x40] sm:$0xff] }
 0x288   : > { %2687 = vmatpush1.bf16.msra.mxu0 %v2686_v51  ;;  %v1488_v51 = vld [vmem:[#allocation9 + $0x3a8] sm:$0xff] }
 0x289   : > { %2689 = vmatprep.subr.bf16.mxu0 %v2688_v52  ;;  %v1490_v52 = vld [vmem:[#allocation9 + $0x3b8] sm:$0xff] }
 0x28a   : > { %v2728_v54 = vpack.c.bf16 %v1490_v52, %v1488_v51  ;;  %v2788_v51 = vpack.c.bf16 %v1776_v50, %v1775_v49  ;;  %v1777_v52 = vld [vmem:[%s3776_s8 + $0x60] sm:$0xff] }
 0x28c   : > { %2691 = vmatpush1.bf16.msra.mxu0 %v2690_v57  ;;  %v1492_v57 = vld [vmem:[#allocation9 + $0x3c8] sm:$0xff] }
 0x28d   : > { %2693 = vmatprep.subr.bf16.mxu0 %v2692_v58  ;;  %v1494_v58 = vld [vmem:[#allocation9 + $0x3d8] sm:$0xff] }
 0x28e   : > { %v2732_v60 = vpack.c.bf16 %v1494_v58, %v1492_v57  ;;  %v2794_v57 = vpack.c.bf16 %v1780_v56, %v1779_v55  ;;  %v3265_v58 = vmov 0.0  }
 0x290   : > { %2695 = vmatpush1.bf16.msra.mxu0 %v2694_v63  ;;  %v924_v63 = vrot.slane %v3618_v15, %v892_v42  ;;  %v1688_v42 = vld [vmem:[#allocation12 + $0xe8] sm:$0xff] }
 0x291   : > { %2697 = vmatprep.subr.bf16.mxu0 %v2696_v0  ;;  %v1496_v0 = vld [vmem:[#allocation9 + $0x3e8] sm:$0xff]  ;;  %v2764_v15 = vpack.c.bf16 %v1688_v42, %v1687_v7 }
 0x292   : > { %v2736_v3 = vpack.c.bf16 %v1498_v1, %v1496_v0  ;;  %v1856_v0 = vld [vmem:[%s3778_s10 + $0x8] sm:$0xff]  ;;  %v1861_v42 = vld [vmem:[%s3778_s10 + $0x30] sm:$0xff] }
 0x293   : > { %2765 = vmatprep.subr.bf16.mxu1 %v2764_v15  ;;  %v1862_v15 = vld [vmem:[%s3778_s10 + $0x38] sm:$0xff] }
 0x294   : > { %2699 = vmatpush1.bf16.msra.mxu0 %v2698_v31  ;;  %v1497_v31 = vld [vmem:[#allocation9 + $0x3f0] sm:$0xff] }
 0x295   : > { %2701 = vmatprep.subr.bf16.mxu0 %v2700_v5  ;;  %v2810_v5 = vadd.f32 %v3627_v21, %v924_v63  ;;  %v2738_v6 = vpack.c.bf16 %v1497_v31, %v1495_v4  ;;  %v1673_v21 = vld [vmem:[#allocation12 + $0x70] sm:$0xff]  ;;  %v1855_v63 = vld [vmem:[%s3778_s10] sm:$0xff] }
 0x296   : > { %v1857_v4 = vld [vmem:[%s3778_s10 + $0x10] sm:$0xff]  ;;  %v1858_v31 = vld [vmem:[%s3778_s10 + $0x18] sm:$0xff] }
 0x297   : > { %v1365_v8 = vmul.f32 0.01, %v2810_v5  ;;  %vm1361_vm3 = vcmp.gt.f32.partialorder %v2810_v5, 0.0 }
 0x298   : > { %2703 = vmatpush1.bf16.msra.mxu0 %v2702_v11  ;;  %v1672_v11 = vld [vmem:[#allocation12 + $0x68] sm:$0xff] }
 0x299   : > { %2705 = vmatprep.subr.bf16.mxu0 %v2704_v13  ;;  %v1369_v9 = vsel %vm1361_vm3, %v2810_v5, %v1365_v8  ;;  %v2766_v13 = vpack.c.bf16 %v1672_v11, %v1671_v10  ;;  %v1859_v8 = vld [vmem:[%s3778_s10 + $0x20] sm:$0xff]  ;;  %v2806_v10 = vpack.c.bf16 %v1862_v15, %v1861_v42  ;;  %v1781_v11 = vld [vmem:[#allocation15] sm:$0x1] }
 0x29b   : > { %2767 = vmatpush3.bf16.msra.mxu1 %v2766_v13 }
 0x29c   : > { %2707 = vmatpush1.bf16.msra.mxu0 %v2706_v19  ;;  %v2770_v19 = vpack.c.bf16 %v1674_v18, %v1673_v21  ;;  %2769 = vmatprep.subr.bf16.mxu1 %v2768_v17 }
 0x29d   : > { %2709 = vmatprep.subr.bf16.mxu0 %v2708_v20  ;;  %v3263_v20 = vmov 0.0|0.0  }
 0x29f   : > { %2771 = vmatpush3.bf16.msra.mxu1 %v2770_v19 }
 0x2a0   : > { %2711 = vmatpush1.bf16.msra.mxu0 %v2710_v27  ;;  %2772 = vmatprep.subr.bf16.mxu1 %v3263_v20 }
 0x2a1   : > { %2713 = vmatprep.subr.bf16.mxu0 %v2712_v28 }
 0x2a4   : > { %2715 = vmatpush1.bf16.msra.mxu0 %v2714_v37 }
 0x2a5   : > { %2717 = vmatprep.subr.bf16.mxu0 %v2716_v34  ;;  %v2773_v34 = vpack.c.bf16 %v1766_v32, %v1765_v30 }
 0x2a8   : > { %2719 = vmatpush1.bf16.msra.mxu0 %v2718_v39  ;;  %v1770_v39 = vld [vmem:[%s3776_s8 + $0x28] sm:$0xff] }
 0x2a9   : > { %2721 = vmatprep.subr.bf16.mxu0 %v2720_v40  ;;  %v2779_v40 = vpack.c.bf16 %v1770_v39, %v1769_v38 }
 0x2ac   : > { %2723 = vmatpush1.bf16.msra.mxu0 %v2722_v47  ;;  %v1774_v47 = vld [vmem:[%s3776_s8 + $0x48] sm:$0xff] }
 0x2ad   : > { %2725 = vmatprep.subr.bf16.mxu0 %v2724_v48  ;;  %v2785_v48 = vpack.c.bf16 %v1774_v47, %v1773_v46 }
 0x2b0   : > { %2727 = vmatpush1.bf16.msra.mxu0 %v2726_v53  ;;  %v1778_v53 = vld [vmem:[%s3776_s8 + $0x68] sm:$0xff] }
 0x2b1   : > { %2729 = vmatprep.subr.bf16.mxu0 %v2728_v54  ;;  %v2791_v54 = vpack.c.bf16 %v1778_v53, %v1777_v52 }
 0x2b4   : > { %2731 = vmatpush1.bf16.msra.mxu0 %v2730_v59 }
 0x2b5   : > { %2733 = vmatprep.subr.bf16.mxu0 %v2732_v60  ;;  %v1691_v60 = vld [vmem:[#allocation13] sm:$0x1] }
 0x2b8   : > { %2735 = vmatpush1.bf16.msra.mxu0 %v2734_v2 }
 0x2b9   : > { %2737 = vmatprep.subr.bf16.mxu0 %v2736_v3  ;;  %v2797_v3 = vpack.c.bf16 %v1856_v0, %v1855_v63 }
 0x2bc   : > { %2739 = vmatpush1.bf16.msra.mxu0 %v2738_v6  ;;  %v2800_v6 = vpack.c.bf16 %v1858_v31, %v1857_v4 }
 0x2bf   : > { %1647 = vmatmul.mubr.f32.vlgmr.msra.gmra.mrb[2].mxu0 %v1369_v9  ;;  %v1860_v9 = vld [vmem:[%s3778_s10 + $0x28] sm:$0xff] }
 0x2c0   : > { %v2803_v7 = vpack.c.bf16 %v1860_v9, %v1859_v8 }
 0x392   : > { %v1648_v26 = vpop.f32.mrb[2].mxu0 }
 0x393   : > { %v2812_v27 = vadd.f32 %v1648_v26, %v1504_v25  ;;  %v1650_v28 = vpop.f32.mrb[3].mxu0 }
 0x394   : > { %v2813_v29 = vadd.f32 %v1650_v28, %v1508_v43 }
 0x395   : > { %v1655_v33 = vmul.f32 0.01, %v2812_v27  ;;  %vm1653_vm4 = vcmp.gt.f32.partialorder %v2812_v27, 0.0 }
 0x396   : > { %v1656_v37 = vmul.f32 0.01, %v2813_v29  ;;  %vm1654_vm5 = vcmp.gt.f32.partialorder %v2813_v29, 0.0 }
 0x397   : > { %v1657_v35 = vsel %vm1653_vm4, %v2812_v27, %v1655_v33 }
 0x398   : > { %v1658_v12 = vsel %vm1654_vm5, %v2813_v29, %v1656_v37 }
 0x399   : > { %1756 = vmatprep.mubr.f32.mxu1 %v1658_v12 }
 0x39a   : > { %1757 = vmatmul.mubr.f32.vlgmr.msra.gmra.mrb[2].mxu1 %v1657_v35 }
 0x39b   : > { %2774 = vmatpush3.bf16.msra.mxu1 %v2773_v34  ;;  %2206 = vmatprep.mubr.msk.f32.mxu1 %vm3264_vm6, %v3265_v58 }
 0x39c   : > { %2775 = vmatprep.subr.bf16.mxu1 %v3263_v20 }
 0x39f   : > { %2777 = vmatpush3.bf16.msra.mxu1 %v2776_v36 }
 0x3a0   : > { %2778 = vmatprep.subr.bf16.mxu1 %v3263_v20 }
 0x3a3   : > { %2780 = vmatpush3.bf16.msra.mxu1 %v2779_v40 }
 0x3a4   : > { %2781 = vmatprep.subr.bf16.mxu1 %v3263_v20 }
 0x3a7   : > { %2783 = vmatpush3.bf16.msra.mxu1 %v2782_v45 }
 0x3a8   : > { %2784 = vmatprep.subr.bf16.mxu1 %v3263_v20 }
 0x3ab   : > { %2786 = vmatpush3.bf16.msra.mxu1 %v2785_v48 }
 0x3ac   : > { %2787 = vmatprep.subr.bf16.mxu1 %v3263_v20 }
 0x3af   : > { %2789 = vmatpush3.bf16.msra.mxu1 %v2788_v51 }
 0x3b0   : > { %2790 = vmatprep.subr.bf16.mxu1 %v3263_v20 }
 0x3b3   : > { %2792 = vmatpush3.bf16.msra.mxu1 %v2791_v54 }
 0x3b4   : > { %2793 = vmatprep.subr.bf16.mxu1 %v3263_v20 }
 0x3b7   : > { %2795 = vmatpush3.bf16.msra.mxu1 %v2794_v57 }
 0x3b8   : > { %2796 = vmatprep.subr.bf16.mxu1 %v3263_v20 }
 0x46d   : > { %v2145_v59 = vpop.f32.mrb[2].mxu1 }
 0x46e   : > { %v2146_v61 = vpop.f32.mrb[3].mxu1 }
 0x46f   : > { %v2147_v62 = vadd.f32 %v2146_v61, %v2145_v59 }
 0x471   : > { %v1759_v1 = vadd.f32 %v2147_v62, %v1691_v60 }
 0x473   : > { %v1763_v2 = vmul.f32 0.01, %v1759_v1  ;;  %vm1762_vm7 = vcmp.gt.f32.partialorder %v1759_v1, 0.0 }
 0x475   : > { %v1764_v5 = vsel %vm1762_vm7, %v1759_v1, %v1763_v2 }
 0x476   : > { %2207 = vmatmul.mubr.f32.vlgmr.msra.gmra.mrb[4].mxu1 %v1764_v5 }
 0x477   : > { %2798 = vmatpush3.bf16.msra.mxu1 %v2797_v3  ;;  %2225 = vmatprep.mubr.msk.f32.mxu1 %vm3264_vm6, %v3265_v58 }
 0x478   : > { %2799 = vmatprep.subr.bf16.mxu1 %v3263_v20 }
 0x47b   : > { %2801 = vmatpush3.bf16.msra.mxu1 %v2800_v6 }
 0x47c   : > { %2802 = vmatprep.subr.bf16.mxu1 %v3263_v20 }
 0x47f   : > { %2804 = vmatpush3.bf16.msra.mxu1 %v2803_v7 }
 0x480   : > { %2805 = vmatprep.subr.bf16.mxu1 %v3263_v20 }
 0x483   : > { %2807 = vmatpush3.bf16.msra.mxu1 %v2806_v10 }
 0x549   : > { %v1848_v13 = vpop.f32.mrb[4].mxu1 }
 0x54a   : > { %v1849_v14 = vadd.f32 %v1848_v13, %v1781_v11  ;;  %v2208_v16 = vpop.f32.mrb[5].mxu1 }
 0x54c   : > { %vm1852_vm8 = vcmp.gt.f32.partialorder %v1849_v14, 0.0  ;;  %v1853_v17 = vmul.f32 0.01, %v1849_v14 }
 0x54e   : > { %v1854_v21 = vsel %vm1852_vm8, %v1849_v14, %v1853_v17 }
 0x54f   : > { %2226 = vmatmul.mubr.msk.f32.vlgmr.msra.gmra.mrb[6].mxu1 %vm1863_vm9, %v1854_v21 }
 0x622   : > { %v1933_v18 = vpop.f32.mrb[6].mxu1 }
 0x623   : > { %1938 = vst.msk [vmem:[%s484_s26] sm:$0x1] %vm1937_vm10, %v1933_v18  ;;  %v2227_v19 = vpop.f32.mrb[7].mxu1 }
 0x624   : > { %3178 = shalt.err (!%p3175_p11)
}
 0x625   : > { %s3179_s16 = scalar_lea.hbm %s3726_s30, 16  ;;  %s3183_s29 = scalar_lea.hbm %s3779_s11, 32 }
 0x626   : > { %p3180_p12 = scmp.ne.s32.totalorder %s3726_s30, %s3179_s16  ;;  %p3184_p6 = scmp.lt.u32.totalorder %s3726_s30, %s3779_s11 }
 0x627   : > { %p3185_p5 = scmp.lt.u32.totalorder %s3183_s29, %s3179_s16  ;;  %p3187_p10 = scmp.lt.u32.totalorder %s3179_s16, %s3726_s30 }
 0x628   : > { %p3181_p13 = pnand %p3180_p12, %p3814_p2 }
 0x629   : > { %p3186_p9 = por %p3185_p5, %p3184_p6 }
 0x62a   : > { %p3182_p1 = pneg %p3181_p13 }
 0x62b   : > { %p3188_p3 = por %p3187_p10, %p3186_p9 }
 0x62d   : > { %p3189_p4 = pnand %p3188_p3, %p3182_p1 }
 0x62f   : > { %3192 = shalt.err (!%p3189_p4)
}
 0x630   : > { %2857 = dma.vmem_to_hbm [thread:$0]  (%p3814_p2), %s3728_s23, 16, %s3726_s30, %s1940_s24  }
 0x631 PF: > { %s3815_s22 = sld [smem:[#allocation23_spill]]  ;;  %s3816_s14 = sld [smem:[#allocation27_spill]] }
 0x632   : > { %p2904_p0 = scmp.ge.s32.totalorder %s3247_s20, 2 }
 0x637   : > { %s1964_s26 = sand.u32 1, %s3815_s22   ;;  %p3817_p7 = scmp.ne.s32.totalorder %s3816_s14, 0 }
 0x638   : > { %s1965_s28 = scalar_lea.sflag [#allocation4], %s1964_s26 }
 0x639   : > { %p2885_p8 = pnand %p2904_p0, %p3817_p7 }
 0x63b   : > { %3230 = dma.done.wait (!%p2885_p8), %s1965_s28, 16  }
 0x63c   : > { %3232 = vsyncadd (!%p2885_p8), %s1965_s28, 4294967280  ;;  %s3818_s20 = sld [smem:[#allocation25_spill]]  ;;  %s3819_s25 = sld [smem:[#allocation24_spill]] }
 0x63d   : > { %s3820_s19 = sld [smem:[#allocation26_spill]]  ;;  %s3821_s17 = smov %s3239_s18 }
 0x642   : > { %p26_p11 = scmp.ge.s32.totalorder %s3818_s20, 4   ;;  %s3822_s18 = smov %s3819_s25 }
 0x644   :  { %28 = sbr.rel (!%p26_p11) target bundleno = 11 (0xb), region = 133 }
 0x64b   :  { %1969 = vsyncpa [#allocation3], 1 }
 0x64c   :  { %1971 = vsyncpa [#allocation3 + $0x1], 1 }
 0x64d   :  { %1972 = vsyncpa [#allocation8], 1 }
 0x64e   :  { %1973 = vsyncpa [#allocation11], 1 }
 0x64f   :  { %1974 = vsyncpa [#allocation14], 1 }
 0x650   :  { %1975 = vsyncpa [#allocation4], 1 }
 0x651   :  { %1977 = vsyncpa [#allocation4 + $0x1], 1 }
 0x652   :  { %1978 = vsyncpa [#allocation5], 1 }
 0x653   :  { %1980 = vsyncpa [#allocation5 + $0x1], 1 }

</bundles_post_ra>
